<compile_context>
chip_gen: v6e
topology: v6e:2x2x1
jax: 0.10.0
libtpu: 0.0.40
codegen_flags: <defaults>
</compile_context>

<pallas_src>
import functools
import math

import jax
import jax.numpy as jnp
from jax.experimental import pallas as pl
from jax.experimental.pallas import tpu as pltpu


def _pos_embed_kernel(yarg_ref, xarg_ref, o_ref, *, npf):
    """Writes one (th, tw, 2*npf) block of the embedding.

    yarg_ref: (th, 1, npf) per-row sine arguments (scale/dim_t and the sin->cos
              phase already folded in on the host).
    xarg_ref: (1, tw, npf) per-column sine arguments.
    o_ref:    (th, tw, 2*npf); [:, :, :npf] = y embedding, [:, :, npf:] = x embedding.
    """
    th = o_ref.shape[0]
    tw = o_ref.shape[1]

    # Reduced transcendental work: (th + tw) * npf sins per block (EUP slot, essentially
    # free next to the store stream), instead of th * tw * 2 * npf.
    y_sin = jnp.sin(yarg_ref[...])                       # (th, 1, npf)
    x_sin = jnp.sin(xarg_ref[...])                       # (1, tw, npf)

    # Per-element work is just a broadcast + store -> HBM-store bound.
    o_ref[:, :, 0:npf] = jnp.broadcast_to(y_sin, (th, tw, npf)).astype(o_ref.dtype)
    o_ref[:, :, npf:] = jnp.broadcast_to(x_sin, (th, tw, npf)).astype(o_ref.dtype)


def _build_args(H, W, num_pos_feats, temperature, normalize, scale):
    """Host-side tiny argument tables: y_arg (H,1,npf), x_arg (1,W,npf), float32."""
    npf = num_pos_feats
    k = jnp.arange(npf, dtype=jnp.float32)
    dim_t = jnp.float32(temperature) ** (2.0 * jnp.floor(k / 2.0) / jnp.float32(npf))
    inv_div = 1.0 / dim_t                                                # (npf,)
    # cos(a) == sin(a + pi/2): fold the sin/cos interleave into a per-feature phase.
    phase = (jnp.arange(npf) % 2).astype(jnp.float32) * jnp.float32(math.pi / 2.0)

    y = jnp.arange(1, H + 1, dtype=jnp.float32)          # cumsum of ones along rows
    x = jnp.arange(1, W + 1, dtype=jnp.float32)          # cumsum of ones along cols
    if normalize:
        eps = 1e-6
        y = y * jnp.float32(scale / (H + eps))
        x = x * jnp.float32(scale / (W + eps))

    y_arg = y[:, None, None] * inv_div[None, None, :] + phase[None, None, :]   # (H,1,npf)
    x_arg = x[None, :, None] * inv_div[None, None, :] + phase[None, None, :]   # (1,W,npf)
    return y_arg, x_arg


def position_embedding_sine(tensor, feature_size, num_pos_feats=128,
                            temperature=10000, normalize=False, scale=None,
                            out_dtype=jnp.float32, block_rows=None):
    """Pallas equivalent of PositionEmbeddingSine.forward(tensor)."""
    if scale is not None and normalize is False:
        raise ValueError('normalize should be True if scale is passed')
    if scale is None:
        scale = 2 * math.pi
    del tensor  # only used for .device in the PyTorch module

    H, W = int(feature_size[0]), int(feature_size[1])
    npf = int(num_pos_feats)
    C = 2 * npf
    elem_bytes = jnp.dtype(out_dtype).itemsize

    # Column tile: full W when small (no divisibility constraint needed), else 512 lanes
    # worth of pixels (multiple of 8 -> satisfies the (8,128) sublane rule).
    tw = W if W <= 512 else 512
    # Row tile: aim for ~4 MiB output blocks (2x buffered output stays well inside the
    # default scoped-VMEM limit on v5e/v6e/v7x) for near-roofline stores.
    row_bytes = max(tw * C * elem_bytes, 1)
    th = max(1, min(H, (4 * 1024 * 1024) // row_bytes))
    if block_rows is not None:
        th = max(1, min(H, int(block_rows)))
    grid = (pl.cdiv(H, th), pl.cdiv(W, tw))

    y_arg, x_arg = _build_args(H, W, npf, temperature, normalize, scale)

    kernel = functools.partial(_pos_embed_kernel, npf=npf)

    out = pl.pallas_call(
        kernel,
        out_shape=jax.ShapeDtypeStruct((H, W, C), out_dtype),
        grid=grid,
        in_specs=[
            pl.BlockSpec((th, 1, npf), lambda i, j: (i, 0, 0)),   # per-row args
            pl.BlockSpec((1, tw, npf), lambda i, j: (0, j, 0)),   # per-col args
        ],
        out_specs=pl.BlockSpec((th, tw, C), lambda i, j: (i, j, 0)),
        # Both axes are independent; lets megacore/v7x shard the grid across cores.
        compiler_params=pltpu.CompilerParams(
            dimension_semantics=("parallel", "parallel")),
    )(y_arg, x_arg)

    # (H, W, C) -> (H*W, C): contiguous, free reshape; matches flatten(0, 1).
    return out.reshape(H * W, C)


def _reference(feature_size, num_pos_feats=128, temperature=10000, normalize=False, scale=None):
    """Pure-JAX reference mirroring the PyTorch forward, for correctness check."""
    if scale is None:
        scale = 2 * math.pi
    H, W = feature_size
    not_mask = jnp.ones((H, W), jnp.float32)
    y_embed = jnp.cumsum(not_mask, axis=0)
    x_embed = jnp.cumsum(not_mask, axis=1)
    if normalize:
        eps = 1e-6
        y_embed = y_embed / (y_embed[-1:, :] + eps) * scale
        x_embed = x_embed / (x_embed[:, -1:] + eps) * scale
    dim_t = jnp.arange(num_pos_feats, dtype=jnp.float32)
    dim_t = temperature ** (2 * (dim_t // 2) / num_pos_feats)
    pos_x = x_embed[:, :, None] / dim_t
    pos_y = y_embed[:, :, None] / dim_t
    pos_x = jnp.stack((jnp.sin(pos_x[:, :, 0::2]), jnp.cos(pos_x[:, :, 1::2])), axis=3).reshape(H, W, -1)
    pos_y = jnp.stack((jnp.sin(pos_y[:, :, 0::2]), jnp.cos(pos_y[:, :, 1::2])), axis=3).reshape(H, W, -1)
    pos = jnp.concatenate((pos_y, pos_x), axis=2).reshape(H * W, -1)
    return pos


if __name__ == "__main__":
    key = jax.random.PRNGKey(0)
    # Input tensor (NCHW) — only its device matters in the original module.
    x = jax.random.normal(key, (2, 4, 16, 16), dtype=jnp.float32)

    feature_size = (16, 16)
    npf = 128

    # Default config (normalize=False), single block.
    pos = position_embedding_sine(x, feature_size, num_pos_feats=npf)
    pos = jax.block_until_ready(pos)
    ref = _reference(feature_size, num_pos_feats=npf)
    assert pos.shape == (feature_size[0] * feature_size[1], 2 * npf)
    assert jnp.allclose(pos, ref, atol=1e-4, rtol=1e-4), float(jnp.abs(pos - ref).max())

    # normalize=True with a small row tile to exercise the multi-block (ragged) grid path.
    pos_n = position_embedding_sine(x, feature_size, num_pos_feats=npf,
                                    normalize=True, scale=2 * math.pi, block_rows=5)
    pos_n = jax.block_until_ready(pos_n)
    ref_n = _reference(feature_size, num_pos_feats=npf, normalize=True, scale=2 * math.pi)
    assert jnp.allclose(pos_n, ref_n, atol=1e-4, rtol=1e-4), float(jnp.abs(pos_n - ref_n).max())

    # Non-square feature map with a different num_pos_feats (masked lane slice path).
    pos_r = position_embedding_sine(x, (12, 20), num_pos_feats=64, normalize=True)
    pos_r = jax.block_until_ready(pos_r)
    ref_r = _reference((12, 20), num_pos_feats=64, normalize=True)
    assert jnp.allclose(pos_r, ref_r, atol=1e-4, rtol=1e-4), float(jnp.abs(pos_r - ref_r).max())

    print("KERNEL_OK")
</pallas_src>

<mosaic_0001>
module attributes {stable_mosaic.version = 11 : i64} {
  func.func @_pos_embed_kernel(%arg0: i32, %arg1: i32, %arg2: memref<16x1x128xf32, #tpu.memory_space<vmem>>, %arg3: memref<1x16x128xf32, #tpu.memory_space<vmem>>, %arg4: memref<16x16x256xf32, #tpu.memory_space<vmem>>) attributes {dimension_semantics = [#tpu.dimension_semantics<parallel>, #tpu.dimension_semantics<parallel>], iteration_bounds = array<i64: 1, 1>, scalar_prefetch = 0 : i64, scratch_operands = 0 : i64, tpu.core_type = #tpu.core_type<tc>, window_params = [{transform_indices = @transform_0, window_bounds = array<i64: 16, 1, 128>}, {transform_indices = @transform_1, window_bounds = array<i64: 1, 16, 128>}, {transform_indices = @transform_2, window_bounds = array<i64: 16, 16, 256>}]} {
    %c0 = arith.constant 0 : index
    %c0_0 = arith.constant 0 : index
    %c0_1 = arith.constant 0 : index
    %0 = vector.load %arg2[%c0, %c0_0, %c0_1] : memref<16x1x128xf32, #tpu.memory_space<vmem>>, vector<16x1x128xf32>
    %1 = math.sin %0 : vector<16x1x128xf32>
    %c0_2 = arith.constant 0 : index
    %c0_3 = arith.constant 0 : index
    %c0_4 = arith.constant 0 : index
    %2 = vector.load %arg3[%c0_2, %c0_3, %c0_4] : memref<1x16x128xf32, #tpu.memory_space<vmem>>, vector<1x16x128xf32>
    %3 = math.sin %2 : vector<1x16x128xf32>
    %4 = vector.shape_cast %1 : vector<16x1x128xf32> to vector<16x1x128xf32>
    %5 = vector.broadcast %4 : vector<16x1x128xf32> to vector<16x16x128xf32>
    %c0_5 = arith.constant 0 : index
    %c0_6 = arith.constant 0 : index
    %c0_7 = arith.constant 0 : index
    %6 = vector.load %arg4[%c0_5, %c0_6, %c0_7] : memref<16x16x256xf32, #tpu.memory_space<vmem>>, vector<16x16x128xf32>
    tpu.vector_store %arg4[%c0_5, %c0_6, %c0_7], %5 {strides = array<i32>} : memref<16x16x256xf32, #tpu.memory_space<vmem>>, vector<16x16x128xf32>,
    %7 = vector.shape_cast %3 : vector<1x16x128xf32> to vector<1x16x128xf32>
    %8 = vector.broadcast %7 : vector<1x16x128xf32> to vector<16x16x128xf32>
    %c0_8 = arith.constant 0 : index
    %c0_9 = arith.constant 0 : index
    %c128 = arith.constant 128 : index
    %9 = vector.load %arg4[%c0_8, %c0_9, %c128] : memref<16x16x256xf32, #tpu.memory_space<vmem>>, vector<16x16x128xf32>
    tpu.vector_store %arg4[%c0_8, %c0_9, %c128], %8 {strides = array<i32>} : memref<16x16x256xf32, #tpu.memory_space<vmem>>, vector<16x16x128xf32>,
    return
  }
  func.func @transform_0(%arg0: i32, %arg1: i32) -> (i32, i32, i32) {
    %c0_i32 = arith.constant 0 : i32
    %c0_i32_0 = arith.constant 0 : i32
    %c0_i32_1 = arith.constant 0 : i32
    return %arg0, %c0_i32, %c0_i32_0 : i32, i32, i32
  }
  func.func @transform_1(%arg0: i32, %arg1: i32) -> (i32, i32, i32) {
    %c0_i32 = arith.constant 0 : i32
    %c0_i32_0 = arith.constant 0 : i32
    %c0_i32_1 = arith.constant 0 : i32
    return %c0_i32, %arg1, %c0_i32_0 : i32, i32, i32
  }
  func.func @transform_2(%arg0: i32, %arg1: i32) -> (i32, i32, i32) {
    %c0_i32 = arith.constant 0 : i32
    %c0_i32_0 = arith.constant 0 : i32
    return %arg0, %arg1, %c0_i32 : i32, i32, i32
  }
}

</mosaic_0001>

<bundles_post_ra>
// kernel: tpu_custom_call.1
= control target key start
LH: loop header
LB: loop body
LE: loop exit
PB: predicated region body
PF: predicated region fallthrough
CT: control target
= control target key end

     0   :  { %7 = vsyncpa [#allocation3], 0  ;;  %s3907_s0 = inlined_call_operand.hbm [shape: f32[16,1,128], index: 0, kind: input, shape index: {}]   ;;  %s3908_s1 = inlined_call_operand.hbm [shape: f32[1,16,128], index: 1, kind: input, shape index: {}]   ;;  %s3909_s2 = inlined_call_operand.hbm [shape: f32[16,16,256], index: 2, kind: output, shape index: {}]  }
   0x1   :  { %8 = vsyncpa [#allocation6], 0 }
   0x2   :  { %9 = vsyncpa [#allocation4], 0  ;;  %s2404_s9 = smov [#allocation2]  }
   0x3   :  { %s15_s10 = sshll.u32 %s2404_s9, 4  ;;  %s16_s10 = int_to_ptr.vmem [resolvable:$true] %s15_s10 }
   0x4   :  { %s2346_s11 = scalar_lea.vmem %s16_s10, 256  ;;  %p2351_p1 = scmp.lt.s32.totalorder %s16_s10, %s16_s10 }
   0x5   :  { %p2347_p0 = scmp.ne.s32.totalorder %s16_s10, %s2346_s11  ;;  %p2352_p2 = scmp.lt.s32.totalorder %s2346_s11, %s2346_s11 }
   0x7   :  { %p2353_p3 = por %p2352_p2, %p2351_p1 }
   0x9   :  { %p2354_p4 = pnand %p2353_p3, %p2347_p0 }
   0xb   :  { %2357 = shalt.err (!%p2354_p4)
}
   0xc   :  { %s2405_s12 = smov 16   ;;  %s2406_s13 = smov 1  }
   0xd   :  { %21 = dma.hbm_to_vmem [thread:$0]  %s3907_s0, 256, %s16_s10, [#allocation3], %s2405_s12, %s2405_s12, %s2406_s13  }
   0xe   :  { %s2407_s16 = smov [#allocation5]  }
   0xf   :  { %s27_s17 = sshll.u32 %s2407_s16, 4  ;;  %s28_s17 = int_to_ptr.vmem [resolvable:$true] %s27_s17 }
  0x10   :  { %s2366_s18 = scalar_lea.vmem %s28_s17, 256  ;;  %p2371_p6 = scmp.lt.s32.totalorder %s28_s17, %s28_s17 }
  0x11   :  { %p2367_p5 = scmp.ne.s32.totalorder %s28_s17, %s2366_s18  ;;  %p2372_p7 = scmp.lt.s32.totalorder %s2366_s18, %s2366_s18 }
  0x13   :  { %p2373_p8 = por %p2372_p7, %p2371_p6 }
  0x15   :  { %p2374_p9 = pnand %p2373_p8, %p2367_p5 }
  0x17   :  { %2377 = shalt.err (!%p2374_p9)
}
  0x18   :  { %s2408_s19 = smov 128   ;;  %s2409_s20 = smov 8  }
  0x19   :  { %33 = dma.hbm_to_vmem [thread:$0]  %s3908_s1, 256, %s28_s17, [#allocation6], %s2408_s19, %s2408_s19, %s2409_s20  }
  0x1a   :  { %2398 = dma.done.wait [#allocation3], 256  }
  0x1b   :  { %2399 = vsyncadd [#allocation3], 4294967040 }
  0x1c   :  { %2400 = dma.done.wait [#allocation6], 256  }
  0x1d   :  { %2401 = vsyncadd [#allocation6], 4294967040  ;;  %v2441_v0 = vld [vmem:[#allocation2] sm:$0x1]  ;;  %v2443_v1 = vld [vmem:[#allocation2 + $0x1] sm:$0x1] }
  0x1e   :  { %v56_v2 = vand.u32 2147483647, %v2441_v0  ;;  %v59_v3 = vand.u32 2139095040, %v2441_v0  ;;  %v2447_v4 = vld [vmem:[#allocation2 + $0x2] sm:$0x1]  ;;  %v163_v6 = vand.u32 2139095040, %v2443_v1 }
  0x1f   :  { %v160_v5 = vand.u32 2147483647, %v2443_v1  ;;  %v267_v11 = vand.u32 2139095040, %v2447_v4  ;;  %v264_v19 = vand.u32 2147483647, %v2447_v4  ;;  %vm58_vm13 = vcmp.lt.s32.totalorder %v2441_v0, 0 }
  0x20   :  { %v60_v7 = vshrl.u32 %v59_v3, 23  ;;  %v63_v8 = vand.u32 8388607, %v56_v2  ;;  %v164_v9 = vshrl.u32 %v163_v6, 23  ;;  %v2410_v31 = vmov 683565275  }
  0x21   :  { %v167_v10 = vand.u32 8388607, %v160_v5  ;;  %v268_v14 = vshrl.u32 %v267_v11, 23  ;;  %v2463_v28 = vand.u32 8388607, %v264_v19  ;;  %s2416_s0 = smov [#allocation7]  }
  0x22   :  { %v2108_v12 = vadd.s32 4294967169, %v60_v7  ;;  %v2112_v13 = vadd.s32 4294967169, %v164_v9  ;;  %v64_v15 = vor.u32 8388608, %v63_v8  ;;  %v2411_v33 = vmov 2475754826   ;;  %s2095_s1 = sshll.u32 %s2416_s0, 4  ;;  %s3896_s1 = int_to_ptr.vmem [resolvable:$true] %s2095_s1 }
  0x23   :  { %v168_v17 = vor.u32 8388608, %v167_v10  ;;  %v2116_v20 = vadd.s32 4294967169, %v268_v14  ;;  %v2412_v35 = vmov 2131351028   ;;  %v2413_v37 = vmov 2102212464   ;;  %p2383_p11 = scmp.lt.s32.totalorder %s3896_s1, %s3896_s1 }
  0x24   :  { %v66_v16 = vadd.s32 1, %v2108_v12  ;;  %v170_v18 = vadd.s32 1, %v2112_v13  ;;  %v2457_v24 = vshll.u32 %v64_v15, 8  ;;  %v2414_v39 = vmov 920167782   ;;  %s2378_s23 = scalar_lea.vmem %s3896_s1, 8192 }
  0x25   :  { %v2459_v27 = vshll.u32 %v168_v17, 8  ;;  %v2465_v29 = vadd.s32 1, %v2116_v20  ;;  %v2415_v47 = vmov 1326507024   ;;  %vm2573_vm15 = vcmp.le.f32.partialorder %v56_v2, 0.7853982  ;;  %p2379_p10 = scmp.ne.s32.totalorder %s3896_s1, %s2378_s23  ;;  %p2384_p12 = scmp.lt.s32.totalorder %s2378_s23, %s2378_s23 }
  0x26   :  { %vm67_vm0 = vcmp.gt.s32.totalorder %v66_v16, 0  ;;  %vm171_vm1 = vcmp.gt.s32.totalorder %v170_v18, 0 }
  0x27   :  { %v68_v21 = vsel %vm67_vm0, %v66_v16, 0  ;;  %v172_v25 = vsel %vm171_vm1, %v170_v18, 0  ;;  %vm275_vm6 = vcmp.gt.s32.totalorder %v2465_v29, 0  ;;  %p2385_p13 = por %p2384_p12, %p2383_p11 }
  0x28   :  { %v69_v22 = vshrl.u32 %v68_v21, 5  ;;  %v70_v23 = vand.u32 31, %v68_v21  ;;  %v174_v26 = vand.u32 31, %v172_v25  ;;  %v2472_v41 = vshrl.u32 %v172_v25, 5 }
  0x29   :  { %p2386_p0 = pnand %p2385_p13, %p2379_p10 }
  0x2a   :  { %v71_v30 = vsub.s32 32, %v70_v23  ;;  %v73_v32 = vshll.u32 %v2410_v31, %v70_v23  ;;  %v76_v34 = vshll.u32 %v2411_v33, %v70_v23  ;;  %v79_v36 = vshll.u32 %v2412_v35, %v70_v23 }
  0x2b   :  { %v82_v38 = vshll.u32 %v2413_v37, %v70_v23  ;;  %v85_v40 = vshll.u32 %v2414_v39, %v70_v23  ;;  %vm88_vm2 = vcmp.lt.s32.totalorder %v69_v22, 1  ;;  %vm89_vm3 = vcmp.lt.s32.totalorder %v69_v22, 2 }
  0x2c   :  { %v72_v42 = vshrl.u32 %v2410_v31, %v71_v30  ;;  %v74_v43 = vshrl.u32 %v2411_v33, %v71_v30  ;;  %v77_v44 = vshrl.u32 %v2412_v35, %v71_v30  ;;  %v80_v45 = vshrl.u32 %v2413_v37, %v71_v30 }
  0x2d   :  { %v83_v46 = vshrl.u32 %v2414_v39, %v71_v30  ;;  %v86_v48 = vshrl.u32 %v2415_v47, %v71_v30  ;;  %vm91_vm4 = vcmp.lt.s32.totalorder %v69_v22, 4  ;;  %v175_v52 = vsub.s32 32, %v174_v26 }
  0x2e   :  { %v75_v49 = vor.u32 %v74_v43, %v73_v32  ;;  %v78_v50 = vor.u32 %v77_v44, %v76_v34  ;;  %v81_v51 = vor.u32 %v80_v45, %v79_v36  ;;  %vm90_vm5 = vcmp.lt.s32.totalorder %v69_v22, 3 }
  0x2f   :  { %v84_v53 = vor.u32 %v83_v46, %v82_v38  ;;  %v87_v54 = vor.u32 %v86_v48, %v85_v40  ;;  %v177_v55 = vshll.u32 %v2410_v31, %v174_v26  ;;  %v180_v63 = vshll.u32 %v2411_v33, %v174_v26 }
  0x30   :  { %v92_v56 = vsel %vm88_vm2, %v72_v42, %v75_v49  ;;  %v93_v57 = vsel %vm91_vm4, %v81_v51, 2102212464  ;;  %v96_v58 = vsel %vm88_vm2, %v75_v49, %v78_v50  ;;  %v100_v59 = vsel %vm88_vm2, %v78_v50, %v81_v51 }
  0x31   :  { %v94_v60 = vsel %vm90_vm5, %v78_v50, %v93_v57  ;;  %v97_v61 = vsel %vm91_vm4, %v84_v53, 920167782  ;;  %v101_v62 = vsel %vm91_vm4, %v87_v54, 1326507024  ;;  %v176_v7 = vshrl.u32 %v2410_v31, %v175_v52 }
  0x32   :  { %v98_v3 = vsel %vm90_vm5, %v81_v51, %v97_v61  ;;  %v102_v6 = vsel %vm90_vm5, %v84_v53, %v101_v62  ;;  %v178_v8 = vshrl.u32 %v2411_v33, %v175_v52  ;;  %v95_v9 = vsel %vm89_vm3, %v92_v56, %v94_v60 }
  0x33   :  { %v99_v10 = vsel %vm89_vm3, %v96_v58, %v98_v3  ;;  %v103_v11 = vsel %vm89_vm3, %v100_v59, %v102_v6  ;;  %v181_v12 = vshrl.u32 %v2412_v35, %v175_v52  ;;  %v183_v20 = vshll.u32 %v2412_v35, %v174_v26  ;;  %v2535_v6 = vld [vmem:[#allocation2 + $0x3] sm:$0x1] }
  0x34   :  { %v2493_v13 = vmul.u32.u64.low %v2457_v24, %v103_v11  ;;  %v2494_v14 = vmul.u32.u64.high %v2457_v24, %v103_v11, %v2493_v13  ;;  %v2497_v15 = vmul.u32.u64.low %v2457_v24, %v99_v10  ;;  %v2498_v16 = vmul.u32.u64.high %v2457_v24, %v99_v10, %v2497_v15 }
  0x35   :  { %v179_v17 = vor.u32 %v178_v8, %v177_v55  ;;  %v182_v18 = vor.u32 %v181_v12, %v180_v63  ;;  %v184_v21 = vshrl.u32 %v2413_v37, %v175_v52  ;;  %v186_v22 = vshll.u32 %v2413_v37, %v174_v26 }
  0x36   :  { %v187_v23 = vshrl.u32 %v2414_v39, %v175_v52  ;;  %v189_v25 = vshll.u32 %v2414_v39, %v174_v26  ;;  %v190_v30 = vshrl.u32 %v2415_v47, %v175_v52  ;;  %v111_v32 = vmul.u32 %v2457_v24, %v95_v9 }
  0x37   :  { %v185_v34 = vor.u32 %v184_v21, %v183_v20  ;;  %vm192_vm7 = vcmp.lt.s32.totalorder %v2472_v41, 1  ;;  %vm193_vm8 = vcmp.lt.s32.totalorder %v2472_v41, 2  ;;  %vm113_vm9 = vc.u32 %v2494_v14, %v2497_v15 }
  0x38   :  { %v114_v36 = vadd.s32 1, %v2498_v16  ;;  %v188_v38 = vor.u32 %v187_v23, %v186_v22  ;;  %vm194_vm10 = vcmp.lt.s32.totalorder %v2472_v41, 3  ;;  %v191_v40 = vor.u32 %v190_v30, %v189_v25 }
  0x39   :  { %vm195_vm11 = vcmp.lt.s32.totalorder %v2472_v41, 4  ;;  %v196_v26 = vsel %vm192_vm7, %v176_v7, %v179_v17  ;;  %v200_v42 = vsel %vm192_vm7, %v179_v17, %v182_v18  ;;  %v204_v45 = vsel %vm192_vm7, %v182_v18, %v185_v34 }
  0x3a   :  { %v115_v24 = vsel %vm113_vm9, %v114_v36, %v2498_v16  ;;  %v197_v43 = vsel %vm195_vm11, %v185_v34, 2102212464  ;;  %v201_v44 = vsel %vm195_vm11, %v188_v38, 920167782  ;;  %v205_v50 = vsel %vm195_vm11, %v191_v40, 1326507024 }
  0x3b   :  { %v116_v46 = vadd.s32 %v115_v24, %v111_v32  ;;  %v198_v48 = vsel %vm194_vm10, %v182_v18, %v197_v43  ;;  %v202_v49 = vsel %vm194_vm10, %v185_v34, %v201_v44  ;;  %v206_v53 = vsel %vm194_vm10, %v188_v38, %v205_v50 }
  0x3c   :  { %v199_v51 = vsel %vm193_vm8, %v196_v26, %v198_v48  ;;  %v203_v52 = vsel %vm193_vm8, %v200_v42, %v202_v49  ;;  %v276_v54 = vsel %vm275_vm6, %v2465_v29, 0  ;;  %v207_v56 = vsel %vm193_vm8, %v204_v45, %v206_v53 }
  0x3d   :  { %v117_v55 = vadd.s32 536870912, %v116_v46  ;;  %v2526_v57 = vmul.u32.u64.low %v2459_v27, %v203_v52  ;;  %v2527_v58 = vmul.u32.u64.high %v2459_v27, %v203_v52, %v2526_v57  ;;  %v1946_v59 = vlaneseq }
  0x3e   :  { %v2531_v60 = vmul.u32.u64.low %v2459_v27, %v207_v56  ;;  %v2532_v61 = vmul.u32.u64.high %v2459_v27, %v207_v56, %v2531_v60  ;;  %v272_v63 = vor.u32 8388608, %v2463_v28  ;;  %v278_v3 = vand.u32 31, %v276_v54 }
  0x3f   :  { %v118_v62 = vshrl.u32 %v117_v55, 30  ;;  %v215_v29 = vmul.u32 %v2459_v27, %v199_v51  ;;  %v218_v7 = vadd.s32 1, %v2527_v58  ;;  %v2539_v9 = vshrl.u32 %v1946_v59, 7 }
  0x40   :  { %v279_v8 = vsub.s32 32, %v278_v3  ;;  %vm217_vm12 = vc.u32 %v2532_v61, %v2526_v57  ;;  %v368_v10 = vand.u32 2147483647, %v2535_v6  ;;  %v371_v11 = vand.u32 2139095040, %v2535_v6 }
  0x41   :  { %v119_v41 = vshll.u32 %v118_v62, 30  ;;  %v219_v12 = vsel %vm217_vm12, %v218_v7, %v2527_v58  ;;  %v2549_v27 = vshrl.u32 %v276_v54, 5  ;;  %v2551_v13 = vshll.u32 %v272_v63, 8 }
  0x42   :  { %v220_v16 = vadd.s32 %v219_v12, %v215_v29  ;;  %v281_v17 = vshll.u32 %v2410_v31, %v278_v3  ;;  %v282_v18 = vshrl.u32 %v2411_v33, %v279_v8  ;;  %v284_v20 = vshll.u32 %v2411_v33, %v278_v3 }
  0x43   :  { %v2546_v28 = vsub.s32 %v116_v46, %v119_v41  ;;  %v285_v22 = vshrl.u32 %v2412_v35, %v279_v8  ;;  %v287_v23 = vshll.u32 %v2412_v35, %v278_v3  ;;  %v288_v25 = vshrl.u32 %v2413_v37, %v279_v8 }
  0x44   :  { %v112_v30 = vadd.s32 %v2497_v15, %v2494_v14  ;;  %v221_v32 = vadd.s32 536870912, %v220_v16  ;;  %v290_v34 = vshll.u32 %v2413_v37, %v278_v3  ;;  %v372_v36 = vshrl.u32 %v371_v11, 23 }
  0x45   :  { %v122_v21 = vsub.s32 0, %v2546_v28  ;;  %v142_v40 = vsub.s32 4, %v118_v62  ;;  %v291_v26 = vshrl.u32 %v2414_v39, %v279_v8  ;;  %vm299_vm14 = vcmp.lt.s32.totalorder %v2549_v27, 4 }
  0x46   :  { %v2566_v42 = vshrl.u32 %v221_v32, 30  ;;  %v280_v24 = vshrl.u32 %v2410_v31, %v279_v8  ;;  %v293_v43 = vshll.u32 %v2414_v39, %v278_v3  ;;  %v294_v44 = vshrl.u32 %v2415_v47, %v279_v8 }
  0x47   :  { %v2109_v38 = vmin.u32 %v122_v21, %v2546_v28  ;;  %v283_v45 = vor.u32 %v282_v18, %v281_v17  ;;  %v286_v46 = vor.u32 %v285_v22, %v284_v20  ;;  %v289_v48 = vor.u32 %v288_v25, %v287_v23 }
  0x48   :  { %v223_v49 = vshll.u32 %v2566_v42, 30  ;;  %v292_v50 = vor.u32 %v291_v26, %v290_v34  ;;  %vm296_vm0 = vcmp.lt.s32.totalorder %v2549_v27, 1  ;;  %vm298_vm1 = vcmp.lt.s32.totalorder %v2549_v27, 3 }
  0x49   :  { %v124_v15 = vclz %v2109_v38  ;;  %v295_v52 = vor.u32 %v294_v44, %v293_v43  ;;  %v301_v53 = vsel %vm299_vm14, %v289_v48, 2102212464  ;;  %v2120_v2 = vadd.s32 4294967169, %v372_v36 }
  0x4a   :  { %v143_v54 = vsel %vm58_vm13, %v142_v40, %v118_v62  ;;  %v2584_v55 = vsub.s32 %v220_v16, %v223_v49  ;;  %vm297_vm2 = vcmp.lt.s32.totalorder %v2549_v27, 2  ;;  %v305_v56 = vsel %vm299_vm14, %v292_v50, 920167782 }
  0x4b   :  { %v2110_v51 = vadd.s32 4294967294, %v124_v15  ;;  %v300_v58 = vsel %vm296_vm0, %v280_v24, %v283_v45  ;;  %v304_v59 = vsel %vm296_vm0, %v283_v45, %v286_v46  ;;  %v306_v60 = vsel %vm298_vm1, %v289_v48, %v305_v56 }
  0x4c   :  { %v226_v62 = vsub.s32 0, %v2584_v55  ;;  %v302_v3 = vsel %vm298_vm1, %v286_v46, %v301_v53  ;;  %v308_v29 = vsel %vm296_vm0, %v286_v46, %v289_v48  ;;  %v309_v11 = vsel %vm299_vm14, %v295_v52, 1326507024 }
  0x4d   :  { %vm2111_vm3 = vcmp.lt.s32.totalorder %v2110_v51, 0  ;;  %v307_v16 = vsel %vm297_vm2, %v304_v59, %v306_v60  ;;  %v310_v17 = vsel %vm298_vm1, %v292_v50, %v309_v11  ;;  %v2610_v18 = vand.u32 8388607, %v368_v10 }
  0x4e   :  { %v127_v63 = vsel %vm2111_vm3, 0, %v2110_v51  ;;  %v2113_v12 = vmin.u32 %v226_v62, %v2584_v55  ;;  %v378_v22 = vadd.s32 1, %v2120_v2  ;;  %v145_v23 = vsel %vm2573_vm15, 0, %v143_v54 }
  0x4f   :  { %v128_v41 = vsub.s32 32, %v127_v63  ;;  %v129_v7 = vshll.u32 %v2546_v28, %v127_v63  ;;  %v132_v8 = vsub.s32 4294967266, %v127_v63  ;;  %v311_v28 = vsel %vm297_vm2, %v308_v29, %v310_v17 }
  0x50   :  { %v2617_v25 = vsub.s32 0, %v2539_v9  ;;  %v228_v32 = vclz %v2113_v12  ;;  %v303_v34 = vsel %vm297_vm2, %v300_v58, %v302_v3  ;;  %vm379_vm4 = vcmp.gt.s32.totalorder %v378_v22, 0 }
  0x51   :  { %v130_v20 = vshrl.u32 %v112_v30, %v128_v41  ;;  %v133_v21 = vadd.s32 127, %v132_v8  ;;  %v2622_v40 = vmul.u32.u64.low %v2551_v13, %v311_v28  ;;  %v2623_v30 = vmul.u32.u64.high %v2551_v13, %v311_v28, %v2622_v40 }
  0x52   :  { %v2114_v26 = vadd.s32 4294967294, %v228_v32  ;;  %v2626_v24 = vmul.u32.u64.low %v2551_v13, %v307_v16  ;;  %v2627_v43 = vmul.u32.u64.high %v2551_v13, %v307_v16, %v2626_v24  ;;  %v376_v15 = vor.u32 8388608, %v2610_v18 }
  0x53   :  { %v131_v36 = vor.u32 %v130_v20, %v129_v7  ;;  %v134_v38 = vshll.u32 %v133_v21, 23  ;;  %v380_v45 = vsel %vm379_vm4, %v378_v22, 0  ;;  %v2631_v27 = vadd.s32 3, %v145_v23 }
  0x54   :  { %v216_v46 = vadd.s32 %v2526_v57, %v2532_v61  ;;  %vm2115_vm5 = vcmp.lt.s32.totalorder %v2114_v26, 0  ;;  %v382_v48 = vand.u32 31, %v380_v45  ;;  %v319_v51 = vmul.u32 %v2551_v13, %v303_v34 }
  0x55   :  { %v135_v44 = vor.u32 4788187, %v134_v38  ;;  %v138_v9 = vcvt.s32.f32 %v131_v36  ;;  %v231_v50 = vsel %vm2115_vm5, 0, %v2114_v26  ;;  %vm321_vm6 = vc.u32 %v2623_v30, %v2626_v24 }
  0x56   :  { %vm162_vm7 = vcmp.lt.s32.totalorder %v2443_v1, 0  ;;  %v232_v52 = vsub.s32 32, %v231_v50  ;;  %v233_v53 = vshll.u32 %v2584_v55, %v231_v50  ;;  %v236_v2 = vsub.s32 4294967266, %v231_v50 }
  0x57   :  { %v136_v49 = vand.u32 2147483647, %v135_v44  ;;  %v322_v54 = vadd.s32 1, %v2627_v43  ;;  %v246_v57 = vsub.s32 4, %v2566_v42  ;;  %v2642_v61 = vshrl.u32 %v380_v45, 5 }
  0x58   :  { %v383_v58 = vsub.s32 32, %v382_v48  ;;  %v234_v59 = vshrl.u32 %v216_v46, %v232_v52  ;;  %v237_v60 = vadd.s32 127, %v236_v2  ;;  %v385_v63 = vshll.u32 %v2410_v31, %v382_v48 }
  0x59   :  { %v139_v56 = vmul.f32 %v138_v9, %v136_v49  ;;  %v323_v13 = vsel %vm321_vm6, %v322_v54, %v2627_v43  ;;  %v388_v55 = vshll.u32 %v2411_v33, %v382_v48  ;;  %vm2650_vm8 = vcmp.le.f32.partialorder %v160_v5, 0.7853982 }
  0x5a   :  { %v324_v3 = vadd.s32 %v323_v13, %v319_v51  ;;  %v386_v29 = vshrl.u32 %v2411_v33, %v383_v58  ;;  %v235_v7 = vor.u32 %v234_v59, %v233_v53  ;;  %v238_v8 = vshll.u32 %v237_v60, 23 }
  0x5b   :  { %v140_v62 = vxor.u32 2147483648, %v139_v56  ;;  %v389_v11 = vshrl.u32 %v2412_v35, %v383_v58  ;;  %v391_v12 = vshll.u32 %v2412_v35, %v382_v48  ;;  %v392_v18 = vshrl.u32 %v2413_v37, %v383_v58 }
  0x5c   :  { %v325_v17 = vadd.s32 536870912, %v324_v3  ;;  %v394_v20 = vshll.u32 %v2413_v37, %v382_v48  ;;  %v239_v21 = vor.u32 4788187, %v238_v8  ;;  %v242_v28 = vcvt.s32.f32 %v235_v7 }
  0x5d   :  { %v141_v16 = vsel %vm58_vm13, %v140_v62, %v139_v56  ;;  %v387_v22 = vor.u32 %v386_v29, %v385_v63  ;;  %v390_v32 = vor.u32 %v389_v11, %v388_v55  ;;  %v395_v34 = vshrl.u32 %v2414_v39, %v383_v58  ;;  %v2715_v29 = vld [vmem:[#allocation2 + $0x4] sm:$0x1] }
  0x5e   :  { %v144_v5 = vsel %vm2573_vm15, %v2441_v0, %v141_v16  ;;  %v2663_v23 = vshrl.u32 %v325_v17, 30  ;;  %v240_v36 = vand.u32 2147483647, %v239_v21  ;;  %v397_v38 = vshll.u32 %v2414_v39, %v382_v48 }
  0x5f   :  { %2266 = vcosq.f32 %v144_v5  ;;  %v398_v40 = vshrl.u32 %v2415_v47, %v383_v58  ;;  %v247_v14 = vsel %vm162_vm7, %v246_v57, %v2566_v42  ;;  %v396_v43 = vor.u32 %v395_v34, %v394_v20 }
  0x60   :  { %2268 = vsinq.f32 %v144_v5  ;;  %v327_v26 = vshll.u32 %v2663_v23, 30  ;;  %vm400_vm9 = vcmp.lt.s32.totalorder %v2642_v61, 1  ;;  %v243_v44 = vmul.f32 %v242_v28, %v240_v36 }
  0x61   :  { %v384_v9 = vshrl.u32 %v2410_v31, %v383_v58  ;;  %v393_v45 = vor.u32 %v392_v18, %v391_v12  ;;  %v2674_v46 = vshll.u32 %v376_v15, 8  ;;  %v399_v48 = vor.u32 %v398_v40, %v397_v38 }
  0x62   :  { %v2676_v49 = vsub.s32 %v324_v3, %v327_v26  ;;  %vm402_vm10 = vcmp.lt.s32.totalorder %v2642_v61, 3  ;;  %vm403_vm11 = vcmp.lt.s32.totalorder %v2642_v61, 4  ;;  %v244_v50 = vxor.u32 2147483648, %v243_v44 }
  0x63   :  { %vm401_vm12 = vcmp.lt.s32.totalorder %v2642_v61, 2  ;;  %v405_v42 = vsel %vm403_vm11, %v393_v45, 2102212464  ;;  %v408_v51 = vsel %vm400_vm9, %v387_v22, %v390_v32  ;;  %v150_v52 = vand.u32 3, %v2631_v27 }
  0x64   :  { %v249_v15 = vsel %vm2650_vm8, 0, %v247_v14  ;;  %v330_v53 = vsub.s32 0, %v2676_v49  ;;  %v409_v2 = vsel %vm403_vm11, %v396_v43, 920167782  ;;  %v245_v54 = vsel %vm162_vm7, %v244_v50, %v243_v44 }
  0x65   :  { %v404_v56 = vsel %vm400_vm9, %v384_v9, %v387_v22  ;;  %v406_v57 = vsel %vm402_vm10, %v390_v32, %v405_v42  ;;  %v410_v27 = vsel %vm402_vm10, %v393_v45, %v409_v2  ;;  %vm148_vm13 = vweird.f32 %v2441_v0 }
  0x66   :  { %v248_v58 = vsel %vm2650_vm8, %v2443_v1, %v245_v54  ;;  %v2117_v59 = vmin.u32 %v330_v53, %v2676_v49  ;;  %v411_v60 = vsel %vm401_vm12, %v408_v51, %v410_v27  ;;  %v412_v13 = vsel %vm400_vm9, %v390_v32, %v393_v45 }
  0x67   :  { %2270 = vcosq.f32 %v248_v58  ;;  %v413_v63 = vsel %vm403_vm11, %v399_v48, 1326507024  ;;  %v2711_v62 = vmul.u32.u64.low %v2674_v46, %v411_v60  ;;  %v2712_v3 = vmul.u32.u64.high %v2674_v46, %v411_v60, %v2711_v62 }
  0x68   :  { %vm151_vm14 = vcmp.lt.s32.totalorder %v150_v52, 2  ;;  %2272 = vsinq.f32 %v248_v58  ;;  %vm266_vm15 = vcmp.lt.s32.totalorder %v2447_v4, 0  ;;  %v332_v55 = vclz %v2117_v59 }
  0x69   :  { %vm152_vm0 = vcmp.eq.s32.totalorder %v150_v52, 0  ;;  %vm155_vm1 = vcmp.eq.s32.totalorder %v150_v52, 2  ;;  %v253_v41 = vadd.s32 3, %v249_v15  ;;  %v414_v7 = vsel %vm402_vm10, %v396_v43, %v413_v63 }
  0x6a   :  { %v2118_v8 = vadd.s32 4294967294, %v332_v55  ;;  %v407_v11 = vsel %vm401_vm12, %v404_v56, %v406_v57  ;;  %v415_v12 = vsel %vm401_vm12, %v412_v13, %v414_v7  ;;  %v475_v16 = vand.u32 2139095040, %v2715_v29 }
  0x6b   :  { %v320_v18 = vadd.s32 %v2626_v24, %v2623_v30  ;;  %v350_v20 = vsub.s32 4, %v2663_v23  ;;  %v2729_v5 = vmul.u32.u64.low %v2674_v46, %v415_v12  ;;  %v2730_v21 = vmul.u32.u64.high %v2674_v46, %v415_v12, %v2729_v5 }
  0x6c   :  { %v2267_v17 = vpop.eup %2266  ;;  %vm2119_vm2 = vcmp.lt.s32.totalorder %v2118_v8, 0  ;;  %v426_v32 = vadd.s32 1, %v2712_v3  ;;  %v476_v34 = vshrl.u32 %v475_v16, 23  ;;  %v254_v36 = vand.u32 3, %v253_v41 }
  0x6d   :  { %v2269_v28 = vpop.eup %2268  ;;  %v156_v22 = vxor.u32 2147483648, %v2267_v17  ;;  %v335_v38 = vsel %vm2119_vm2, 0, %v2118_v8  ;;  %v423_v40 = vmul.u32 %v2674_v46, %v407_v11  ;;  %v351_v44 = vsel %vm266_vm15, %v350_v20, %v2663_v23 }
  0x6e   :  { %v153_v61 = vxor.u32 2147483648, %v2269_v28  ;;  %v336_v30 = vsub.s32 32, %v335_v38  ;;  %v337_v24 = vshll.u32 %v2676_v49, %v335_v38  ;;  %v340_v26 = vsub.s32 4294967266, %v335_v38 }
  0x6f   :  { %v157_v14 = vsel %vm155_vm1, %v156_v22, %v2269_v28  ;;  %vm425_vm3 = vc.u32 %v2730_v21, %v2711_v62  ;;  %v2124_v9 = vadd.s32 4294967169, %v476_v34  ;;  %v472_v51 = vand.u32 2147483647, %v2715_v29 }
  0x70   :  { %v154_v43 = vsel %vm152_vm0, %v2267_v17, %v153_v61  ;;  %v338_v48 = vshrl.u32 %v320_v18, %v336_v30  ;;  %v341_v46 = vadd.s32 127, %v340_v26  ;;  %v427_v50 = vsel %vm425_vm3, %v426_v32, %v2712_v3  ;;  %v2766_v18 = vld [vmem:[#allocation2 + $0x5] sm:$0x1] }
  0x71   :  { %v158_v45 = vsel %vm151_vm14, %v154_v43, %v157_v14  ;;  %v428_v42 = vadd.s32 %v427_v50, %v423_v40  ;;  %v482_v15 = vadd.s32 1, %v2124_v9  ;;  %vm2750_vm4 = vcmp.le.f32.partialorder %v264_v19, 0.7853982 }
  0x72   :  { %v159_v49 = vsel %vm148_vm13, nan, %v158_v45  ;;  %v339_v52 = vor.u32 %v338_v48, %v337_v24  ;;  %v342_v2 = vshll.u32 %v341_v46, 23  ;;  %vm256_vm5 = vcmp.eq.s32.totalorder %v254_v36, 0 }
  0x73   :  { %v1949_v53 = vrot.slane %v159_v49, %v2617_v25  ;;  %vm259_vm6 = vcmp.eq.s32.totalorder %v254_v36, 2  ;;  %v429_v54 = vadd.s32 536870912, %v428_v42  ;;  %vm483_vm7 = vcmp.gt.s32.totalorder %v482_v15, 0 }
  0x74   :  { %v2271_v0 = vpop.eup %2270  ;;  %v343_v56 = vor.u32 4788187, %v342_v2  ;;  %v346_v57 = vcvt.s32.f32 %v339_v52  ;;  %v353_v27 = vsel %vm2750_vm4, 0, %v351_v44  ;;  %v484_v58 = vsel %vm483_vm7, %v482_v15, 0 }
  0x75   :  { %2026 = vst [vmem:[#allocation7] sm:$0xff] %v1949_v53  ;;  %2027 = vst [vmem:[#allocation7 + $0x10] sm:$0xff] %v1949_v53  ;;  %v2273_v59 = vpop.eup %2272  ;;  %v260_v19 = vxor.u32 2147483648, %v2271_v0  ;;  %v2756_v60 = vshrl.u32 %v429_v54, 30  ;;  %v479_v13 = vand.u32 8388607, %v472_v51  ;;  %vm252_vm9 = vweird.f32 %v2443_v1 }
  0x76   :  { %v486_v63 = vand.u32 31, %v484_v58  ;;  %vm255_vm8 = vcmp.lt.s32.totalorder %v254_v36, 2  ;;  %v257_v3 = vxor.u32 2147483648, %v2273_v59  ;;  %v344_v55 = vand.u32 2147483647, %v343_v56 }
  0x77   :  { %v261_v41 = vsel %vm259_vm6, %v260_v19, %v2273_v59  ;;  %v431_v7 = vshll.u32 %v2756_v60, 30  ;;  %v357_v16 = vadd.s32 3, %v353_v27  ;;  %v424_v17 = vadd.s32 %v2711_v62, %v2730_v21 }
  0x78   :  { %v487_v8 = vsub.s32 32, %v486_v63  ;;  %v258_v11 = vsel %vm256_vm5, %v2271_v0, %v257_v3  ;;  %v347_v12 = vmul.f32 %v346_v57, %v344_v55  ;;  %v480_v28 = vor.u32 8388608, %v479_v13 }
  0x79   :  { %v262_v20 = vsel %vm255_vm8, %v258_v11, %v261_v41  ;;  %v2768_v5 = vsub.s32 %v428_v42, %v431_v7  ;;  %v489_v1 = vshll.u32 %v2410_v31, %v486_v63  ;;  %v492_v61 = vshll.u32 %v2411_v33, %v486_v63 }
  0x7a   :  { %v263_v22 = vsel %vm252_vm9, nan, %v262_v20  ;;  %v348_v32 = vxor.u32 2147483648, %v347_v12  ;;  %v490_v34 = vshrl.u32 %v2411_v33, %v487_v8  ;;  %v493_v62 = vshrl.u32 %v2412_v35, %v487_v8 }
  0x7b   :  { %v1953_v36 = vrot.slane %v263_v22, %v2617_v25  ;;  %v434_v38 = vsub.s32 0, %v2768_v5  ;;  %v579_v21 = vand.u32 2139095040, %v2766_v18  ;;  %v485_v14 = vshrl.u32 %v484_v58, 5 }
  0x7c   :  { %v349_v40 = vsel %vm266_vm15, %v348_v32, %v347_v12  ;;  %v495_v30 = vshll.u32 %v2412_v35, %v486_v63  ;;  %v496_v24 = vshrl.u32 %v2413_v37, %v487_v8  ;;  %v488_v44 = vshrl.u32 %v2410_v31, %v487_v8 }
  0x7d   :  { %2028 = vst [vmem:[#allocation7 + $0x20] sm:$0xff] %v1953_v36  ;;  %2029 = vst [vmem:[#allocation7 + $0x30] sm:$0xff] %v1953_v36  ;;  %v352_v26 = vsel %vm2750_vm4, %v2447_v4, %v349_v40  ;;  %v2121_v43 = vmin.u32 %v434_v38, %v2768_v5  ;;  %v491_v9 = vor.u32 %v490_v34, %v489_v1  ;;  %v2788_v42 = vshll.u32 %v480_v28, 8 }
  0x7e   :  { %2274 = vcosq.f32 %v352_v26  ;;  %v494_v45 = vor.u32 %v493_v62, %v492_v61  ;;  %v498_v48 = vshll.u32 %v2413_v37, %v486_v63  ;;  %v499_v46 = vshrl.u32 %v2414_v39, %v487_v8 }
  0x7f   :  { %2276 = vsinq.f32 %v352_v26  ;;  %v436_v50 = vclz %v2121_v43  ;;  %v497_v49 = vor.u32 %v496_v24, %v495_v30  ;;  %vm370_vm10 = vcmp.lt.s32.totalorder %v2535_v6, 0 }
  0x80   :  { %v500_v15 = vor.u32 %v499_v46, %v498_v48  ;;  %v501_v53 = vshll.u32 %v2414_v39, %v486_v63  ;;  %v502_v23 = vshrl.u32 %v2415_v47, %v487_v8  ;;  %v580_v52 = vshrl.u32 %v579_v21, 23 }
  0x81   :  { %v2122_v2 = vadd.s32 4294967294, %v436_v50  ;;  %vm504_vm11 = vcmp.lt.s32.totalorder %v485_v14, 1  ;;  %vm505_vm12 = vcmp.lt.s32.totalorder %v485_v14, 2  ;;  %vm506_vm13 = vcmp.lt.s32.totalorder %v485_v14, 3 }
  0x82   :  { %v503_v54 = vor.u32 %v502_v23, %v501_v53  ;;  %vm507_vm14 = vcmp.lt.s32.totalorder %v485_v14, 4  ;;  %v508_v0 = vsel %vm504_vm11, %v488_v44, %v491_v9  ;;  %v512_v56 = vsel %vm504_vm11, %v491_v9, %v494_v45 }
  0x83   :  { %vm2123_vm15 = vcmp.lt.s32.totalorder %v2122_v2, 0  ;;  %v509_v57 = vsel %vm507_vm14, %v497_v49, 2102212464  ;;  %v513_v27 = vsel %vm507_vm14, %v500_v15, 920167782  ;;  %v516_v58 = vsel %vm504_vm11, %v494_v45, %v497_v49 }
  0x84   :  { %v439_v59 = vsel %vm2123_vm15, 0, %v2122_v2  ;;  %v510_v19 = vsel %vm506_vm13, %v494_v45, %v509_v57  ;;  %v514_v13 = vsel %vm506_vm13, %v497_v49, %v513_v27  ;;  %v517_v63 = vsel %vm507_vm14, %v503_v54, 1326507024 }
  0x85   :  { %v440_v3 = vsub.s32 32, %v439_v59  ;;  %v441_v55 = vshll.u32 %v2768_v5, %v439_v59  ;;  %v444_v41 = vsub.s32 4294967266, %v439_v59  ;;  %v454_v7 = vsub.s32 4, %v2756_v60 }
  0x86   :  { %vm356_vm0 = vweird.f32 %v2447_v4  ;;  %v358_v8 = vand.u32 3, %v357_v16  ;;  %v515_v11 = vsel %vm505_vm12, %v512_v56, %v514_v13  ;;  %v518_v12 = vsel %vm506_vm13, %v500_v15, %v517_v63 }
  0x87   :  { %v2128_v20 = vadd.s32 4294967169, %v580_v52  ;;  %v442_v28 = vshrl.u32 %v424_v17, %v440_v3  ;;  %v445_v1 = vadd.s32 127, %v444_v41  ;;  %v511_v22 = vsel %vm505_vm12, %v508_v0, %v510_v19  ;;  %v2838_v19 = vld [vmem:[#allocation2 + $0x6] sm:$0x1] }
  0x88   :  { %v519_v32 = vsel %vm505_vm12, %v516_v58, %v518_v12  ;;  %v2807_v61 = vmul.u32.u64.low %v2788_v42, %v515_v11  ;;  %v2808_v36 = vmul.u32.u64.high %v2788_v42, %v515_v11, %v2807_v61  ;;  %v455_v17 = vsel %vm370_vm10, %v454_v7, %v2756_v60 }
  0x89   :  { %v2803_v34 = vmul.u32.u64.low %v2788_v42, %v519_v32  ;;  %v2804_v5 = vmul.u32.u64.high %v2788_v42, %v519_v32, %v2803_v34  ;;  %v443_v16 = vor.u32 %v442_v28, %v441_v55  ;;  %v446_v38 = vshll.u32 %v445_v1, 23 }
  0x8a   :  { %v586_v62 = vadd.s32 1, %v2128_v20  ;;  %vm360_vm1 = vcmp.eq.s32.totalorder %v358_v8, 0  ;;  %vm363_vm2 = vcmp.eq.s32.totalorder %v358_v8, 2  ;;  %vm2816_vm3 = vcmp.le.f32.partialorder %v368_v10, 0.7853982 }
  0x8b   :  { %v576_v40 = vand.u32 2147483647, %v2766_v18  ;;  %v2275_v14 = vpop.eup %2274  ;;  %v447_v30 = vor.u32 4788187, %v446_v38  ;;  %v450_v24 = vcvt.s32.f32 %v443_v16  ;;  %v527_v26 = vmul.u32 %v2788_v42, %v511_v22 }
  0x8c   :  { %vm587_vm4 = vcmp.gt.s32.totalorder %v586_v62, 0  ;;  %v2277_v43 = vpop.eup %2276  ;;  %v364_v44 = vxor.u32 2147483648, %v2275_v14  ;;  %v457_v60 = vsel %vm2816_vm3, 0, %v455_v17  ;;  %vm529_vm5 = vc.u32 %v2804_v5, %v2807_v61 }
  0x8d   :  { %v530_v10 = vadd.s32 1, %v2808_v36  ;;  %vm359_vm6 = vcmp.lt.s32.totalorder %v358_v8, 2  ;;  %v361_v9 = vxor.u32 2147483648, %v2277_v43  ;;  %v448_v45 = vand.u32 2147483647, %v447_v30 }
  0x8e   :  { %v588_v48 = vsel %vm587_vm4, %v586_v62, 0  ;;  %v365_v46 = vsel %vm363_vm2, %v364_v44, %v2277_v43  ;;  %v583_v49 = vand.u32 8388607, %v576_v40  ;;  %v461_v23 = vadd.s32 3, %v457_v60 }
  0x8f   :  { %v531_v50 = vsel %vm529_vm5, %v530_v10, %v2808_v36  ;;  %v590_v42 = vand.u32 31, %v588_v48  ;;  %v362_v15 = vsel %vm360_vm1, %v2275_v14, %v361_v9  ;;  %v451_v53 = vmul.f32 %v450_v24, %v448_v45 }
  0x90   :  { %v532_v52 = vadd.s32 %v531_v50, %v527_v26  ;;  %v366_v2 = vsel %vm359_vm6, %v362_v15, %v365_v46  ;;  %v2832_v54 = vshrl.u32 %v588_v48, 5  ;;  %v584_v12 = vor.u32 8388608, %v583_v49 }
  0x91   :  { %v591_v0 = vsub.s32 32, %v590_v42  ;;  %v593_v56 = vshll.u32 %v2410_v31, %v590_v42  ;;  %v367_v57 = vsel %vm356_vm0, nan, %v366_v2  ;;  %v452_v27 = vxor.u32 2147483648, %v451_v53 }
  0x92   :  { %v533_v58 = vadd.s32 536870912, %v532_v52  ;;  %v596_v59 = vshll.u32 %v2411_v33, %v590_v42  ;;  %v1957_v13 = vrot.slane %v367_v57, %v2617_v25  ;;  %v599_v55 = vshll.u32 %v2412_v35, %v590_v42 }
  0x93   :  { %v594_v63 = vshrl.u32 %v2411_v33, %v591_v0  ;;  %v597_v3 = vshrl.u32 %v2412_v35, %v591_v0  ;;  %v453_v41 = vsel %vm370_vm10, %v452_v27, %v451_v53  ;;  %v600_v4 = vshrl.u32 %v2413_v37, %v591_v0 }
  0x94   :  { %v2846_v7 = vshrl.u32 %v533_v58, 30  ;;  %v602_v8 = vshll.u32 %v2413_v37, %v590_v42  ;;  %2030 = vst [vmem:[#allocation7 + $0x40] sm:$0xff] %v1957_v13  ;;  %2031 = vst [vmem:[#allocation7 + $0x50] sm:$0xff] %v1957_v13  ;;  %v456_v11 = vsel %vm2816_vm3, %v2535_v6, %v453_v41  ;;  %v603_v20 = vshrl.u32 %v2414_v39, %v591_v0 }
  0x95   :  { %v683_v28 = vand.u32 2139095040, %v2838_v19  ;;  %2278 = vcosq.f32 %v456_v11  ;;  %v595_v22 = vor.u32 %v594_v63, %v593_v56  ;;  %v598_v32 = vor.u32 %v597_v3, %v596_v59 }
  0x96   :  { %v535_v1 = vshll.u32 %v2846_v7, 30  ;;  %2280 = vsinq.f32 %v456_v11  ;;  %v604_v34 = vor.u32 %v603_v20, %v602_v8  ;;  %v605_v36 = vshll.u32 %v2414_v39, %v590_v42 }
  0x97   :  { %v606_v16 = vshrl.u32 %v2415_v47, %v591_v0  ;;  %v592_v17 = vshrl.u32 %v2410_v31, %v591_v0  ;;  %v601_v62 = vor.u32 %v600_v4, %v599_v55  ;;  %vm608_vm7 = vcmp.lt.s32.totalorder %v2832_v54, 1 }
  0x98   :  { %v2858_v38 = vsub.s32 %v532_v52, %v535_v1  ;;  %vm610_vm8 = vcmp.lt.s32.totalorder %v2832_v54, 3  ;;  %vm611_vm9 = vcmp.lt.s32.totalorder %v2832_v54, 4  ;;  %v684_v14 = vshrl.u32 %v683_v28, 23 }
  0x99   :  { %v607_v21 = vor.u32 %v606_v16, %v605_v36  ;;  %vm609_vm10 = vcmp.lt.s32.totalorder %v2832_v54, 2  ;;  %v613_v24 = vsel %vm611_vm9, %v601_v62, 2102212464  ;;  %v462_v26 = vand.u32 3, %v461_v23 }
  0x9a   :  { %v538_v30 = vsub.s32 0, %v2858_v38  ;;  %v616_v43 = vsel %vm608_vm7, %v595_v22, %v598_v32  ;;  %v617_v44 = vsel %vm611_vm9, %v604_v34, 920167782  ;;  %v624_v60 = vshll.u32 %v584_v12, 8 }
  0x9b   :  { %v612_v9 = vsel %vm608_vm7, %v592_v17, %v595_v22  ;;  %v614_v45 = vsel %vm610_vm8, %v598_v32, %v613_v24  ;;  %v618_v48 = vsel %vm610_vm8, %v601_v62, %v617_v44  ;;  %v620_v50 = vsel %vm608_vm7, %v598_v32, %v601_v62 }
  0x9c   :  { %v2125_v10 = vmin.u32 %v538_v30, %v2858_v38  ;;  %v619_v46 = vsel %vm609_vm10, %v616_v43, %v618_v48  ;;  %v621_v49 = vsel %vm611_vm9, %v607_v21, 1326507024  ;;  %v2132_v42 = vadd.s32 4294967169, %v684_v14 }
  0x9d   :  { %vm460_vm11 = vweird.f32 %v2535_v6  ;;  %v680_v53 = vand.u32 2147483647, %v2838_v19  ;;  %v615_v23 = vsel %vm609_vm10, %v612_v9, %v614_v45  ;;  %v622_v52 = vsel %vm610_vm8, %v604_v34, %v621_v49 }
  0x9e   :  { %v540_v15 = vclz %v2125_v10  ;;  %v2885_v2 = vmul.u32.u64.low %v624_v60, %v619_v46  ;;  %v2886_v0 = vmul.u32.u64.high %v624_v60, %v619_v46, %v2885_v2  ;;  %vm464_vm12 = vcmp.eq.s32.totalorder %v462_v26, 0 }
  0x9f   :  { %v623_v57 = vsel %vm609_vm10, %v620_v50, %v622_v52  ;;  %v690_v27 = vadd.s32 1, %v2132_v42  ;;  %vm467_vm13 = vcmp.eq.s32.totalorder %v462_v26, 2  ;;  %v528_v58 = vadd.s32 %v2807_v61, %v2804_v5 }
  0xa0   :  { %v2126_v56 = vadd.s32 4294967294, %v540_v15  ;;  %v2893_v59 = vmul.u32.u64.low %v624_v60, %v623_v57  ;;  %v2894_v13 = vmul.u32.u64.high %v624_v60, %v623_v57, %v2893_v59  ;;  %v558_v63 = vsub.s32 4, %v2846_v7 }
  0xa1   :  { %v631_v3 = vmul.u32 %v624_v60, %v615_v23  ;;  %vm691_vm15 = vcmp.gt.s32.totalorder %v690_v27, 0  ;;  %v634_v4 = vadd.s32 1, %v2886_v0  ;;  %v687_v54 = vand.u32 8388607, %v680_v53 }
  0xa2   :  { %vm2127_vm14 = vcmp.lt.s32.totalorder %v2126_v56, 0  ;;  %v2279_v55 = vpop.eup %2278  ;;  %v692_v8 = vsel %vm691_vm15, %v690_v27, 0  ;;  %vm463_vm0 = vcmp.lt.s32.totalorder %v462_v26, 2  ;;  %vm474_vm1 = vcmp.lt.s32.totalorder %v2715_v29, 0 }
  0xa3   :  { %v543_v41 = vsel %vm2127_vm14, 0, %v2126_v56  ;;  %v2281_v11 = vpop.eup %2280  ;;  %v468_v12 = vxor.u32 2147483648, %v2279_v55  ;;  %vm633_vm2 = vc.u32 %v2894_v13, %v2885_v2  ;;  %v2910_v16 = vsel %vm474_vm1, %v558_v63, %v2846_v7 }
  0xa4   :  { %v544_v20 = vsub.s32 32, %v543_v41  ;;  %v545_v5 = vshll.u32 %v2858_v38, %v543_v41  ;;  %v548_v61 = vsub.s32 4294967266, %v543_v41  ;;  %v465_v28 = vxor.u32 2147483648, %v2281_v11 }
  0xa5   :  { %v469_v1 = vsel %vm467_vm13, %v468_v12, %v2281_v11  ;;  %v635_v34 = vsel %vm633_vm2, %v634_v4, %v2886_v0  ;;  %v694_v17 = vand.u32 31, %v692_v8  ;;  %vm2914_vm3 = vcmp.le.f32.partialorder %v472_v51, 0.7853982 }
  0xa6   :  { %v546_v22 = vshrl.u32 %v528_v58, %v544_v20  ;;  %v549_v32 = vadd.s32 127, %v548_v61  ;;  %v466_v36 = vsel %vm464_vm12, %v2279_v55, %v465_v28  ;;  %v636_v38 = vadd.s32 %v635_v34, %v631_v3  ;;  %v2949_v20 = vld [vmem:[#allocation2 + $0x7] sm:$0x1] }
  0xa7   :  { %v470_v62 = vsel %vm463_vm0, %v466_v36, %v469_v1  ;;  %v688_v24 = vor.u32 8388608, %v687_v54  ;;  %v2920_v44 = vshrl.u32 %v692_v8, 5  ;;  %v695_v7 = vsub.s32 32, %v694_v17 }
  0xa8   :  { %v547_v14 = vor.u32 %v546_v22, %v545_v5  ;;  %v550_v30 = vshll.u32 %v549_v32, 23  ;;  %v471_v26 = vsel %vm460_vm11, nan, %v470_v62  ;;  %v637_v43 = vadd.s32 536870912, %v636_v38 }
  0xa9   :  { %v1961_v60 = vrot.slane %v471_v26, %v2617_v25  ;;  %v697_v45 = vshll.u32 %v2410_v31, %v694_v17  ;;  %v698_v48 = vshrl.u32 %v2411_v33, %v695_v7  ;;  %v700_v46 = vshll.u32 %v2411_v33, %v694_v17 }
  0xaa   :  { %v551_v10 = vor.u32 4788187, %v550_v30  ;;  %v554_v9 = vcvt.s32.f32 %v547_v14  ;;  %v638_v51 = vshrl.u32 %v637_v43, 30  ;;  %v701_v50 = vshrl.u32 %v2412_v35, %v695_v7 }
  0xab   :  { %2032 = vst [vmem:[#allocation7 + $0x60] sm:$0xff] %v1961_v60  ;;  %2033 = vst [vmem:[#allocation7 + $0x70] sm:$0xff] %v1961_v60  ;;  %v703_v49 = vshll.u32 %v2412_v35, %v694_v17  ;;  %v704_v42 = vshrl.u32 %v2413_v37, %v695_v7  ;;  %v706_v15 = vshll.u32 %v2413_v37, %v694_v17  ;;  %vm712_vm4 = vcmp.lt.s32.totalorder %v2920_v44, 1 }
  0xac   :  { %v552_v6 = vand.u32 2147483647, %v551_v10  ;;  %v639_v23 = vshll.u32 %v638_v51, 30  ;;  %vm713_vm5 = vcmp.lt.s32.totalorder %v2920_v44, 2  ;;  %v2932_v52 = vshll.u32 %v688_v24, 8 }
  0xad   :  { %v696_v56 = vshrl.u32 %v2410_v31, %v695_v7  ;;  %v707_v57 = vshrl.u32 %v2414_v39, %v695_v7  ;;  %v709_v27 = vshll.u32 %v2414_v39, %v694_v17  ;;  %v699_v59 = vor.u32 %v698_v48, %v697_v45 }
  0xae   :  { %v555_v0 = vmul.f32 %v554_v9, %v552_v6  ;;  %v2937_v58 = vsub.s32 %v636_v38, %v639_v23  ;;  %v702_v63 = vor.u32 %v701_v50, %v700_v46  ;;  %v710_v3 = vshrl.u32 %v2415_v47, %v695_v7 }
  0xaf   :  { %v705_v41 = vor.u32 %v704_v42, %v703_v49  ;;  %v708_v4 = vor.u32 %v707_v57, %v706_v15  ;;  %vm715_vm6 = vcmp.lt.s32.totalorder %v2920_v44, 4  ;;  %vm2943_vm7 = vcmp.le.f32.partialorder %v576_v40, 0.7853982 }
  0xb0   :  { %v556_v55 = vxor.u32 2147483648, %v555_v0  ;;  %v642_v8 = vsub.s32 0, %v2937_v58  ;;  %v662_v11 = vsub.s32 4, %v638_v51  ;;  %v711_v12 = vor.u32 %v710_v3, %v709_v27 }
  0xb1   :  { %vm714_vm8 = vcmp.lt.s32.totalorder %v2920_v44, 3  ;;  %v716_v61 = vsel %vm712_vm4, %v696_v56, %v699_v59  ;;  %v717_v40 = vsel %vm715_vm6, %v705_v41, 2102212464  ;;  %v721_v28 = vsel %vm715_vm6, %v708_v4, 920167782 }
  0xb2   :  { %v557_v5 = vsel %vm474_vm1, %v556_v55, %v555_v0  ;;  %v2129_v22 = vmin.u32 %v642_v8, %v2937_v58  ;;  %v718_v32 = vsel %vm714_vm8, %v702_v63, %v717_v40  ;;  %v720_v34 = vsel %vm712_vm4, %v699_v59, %v702_v63 }
  0xb3   :  { %v560_v1 = vsel %vm2914_vm3, %v2715_v29, %v557_v5  ;;  %vm578_vm9 = vcmp.lt.s32.totalorder %v2766_v18, 0  ;;  %v722_v36 = vsel %vm714_vm8, %v705_v41, %v721_v28  ;;  %v787_v38 = vand.u32 2139095040, %v2949_v20 }
  0xb4   :  { %2282 = vcosq.f32 %v560_v1  ;;  %v561_v17 = vsel %vm2914_vm3, 0, %v2910_v16  ;;  %v644_v62 = vclz %v2129_v22  ;;  %v724_v14 = vsel %vm712_vm4, %v702_v63, %v705_v41 }
  0xb5   :  { %2284 = vsinq.f32 %v560_v1  ;;  %v663_v30 = vsel %vm578_vm9, %v662_v11, %v638_v51  ;;  %v719_v24 = vsel %vm713_vm5, %v716_v61, %v718_v32  ;;  %v723_v26 = vsel %vm713_vm5, %v720_v34, %v722_v36 }
  0xb6   :  { %v725_v43 = vsel %vm715_vm6, %v711_v12, 1326507024  ;;  %v2130_v7 = vadd.s32 4294967294, %v644_v62  ;;  %v2987_v21 = vmul.u32.u64.low %v2932_v52, %v723_v26  ;;  %v2988_v60 = vmul.u32.u64.high %v2932_v52, %v723_v26, %v2987_v21 }
  0xb7   :  { %v726_v16 = vsel %vm714_vm8, %v708_v4, %v725_v43  ;;  %v565_v10 = vadd.s32 3, %v561_v17  ;;  %v784_v45 = vand.u32 2147483647, %v2949_v20  ;;  %v788_v51 = vshrl.u32 %v787_v38, 23  ;;  %v3011_v4 = vld [vmem:[#allocation2 + $0x8] sm:$0x1] }
  0xb8   :  { %v727_v9 = vsel %vm713_vm5, %v724_v14, %v726_v16  ;;  %v632_v48 = vadd.s32 %v2885_v2, %v2894_v13  ;;  %vm2131_vm10 = vcmp.lt.s32.totalorder %v2130_v7, 0  ;;  %v665_v49 = vsel %vm2943_vm7, 0, %v663_v30 }
  0xb9   :  { %v2997_v46 = vmul.u32.u64.low %v2932_v52, %v727_v9  ;;  %v2998_v50 = vmul.u32.u64.high %v2932_v52, %v727_v9, %v2997_v46  ;;  %v647_v6 = vsel %vm2131_vm10, 0, %v2130_v7  ;;  %v735_v42 = vmul.u32 %v2932_v52, %v719_v24 }
  0xba   :  { %v2136_v15 = vadd.s32 4294967169, %v788_v51  ;;  %v648_v44 = vsub.s32 32, %v647_v6  ;;  %v649_v23 = vshll.u32 %v2937_v58, %v647_v6  ;;  %v652_v0 = vsub.s32 4294967266, %v647_v6 }
  0xbb   :  { %v738_v56 = vadd.s32 1, %v2988_v60  ;;  %v566_v57 = vand.u32 3, %v565_v10  ;;  %v669_v59 = vadd.s32 3, %v665_v49  ;;  %vm737_vm11 = vc.u32 %v2998_v50, %v2987_v21 }
  0xbc   :  { %v794_v2 = vadd.s32 1, %v2136_v15  ;;  %v650_v13 = vshrl.u32 %v632_v48, %v648_v44  ;;  %v653_v27 = vadd.s32 127, %v652_v0  ;;  %vm564_vm12 = vweird.f32 %v2715_v29 }
  0xbd   :  { %v739_v63 = vsel %vm737_vm11, %v738_v56, %v2988_v60  ;;  %v791_v52 = vand.u32 8388607, %v784_v45  ;;  %vm567_vm14 = vcmp.lt.s32.totalorder %v566_v57, 2  ;;  %vm568_vm15 = vcmp.eq.s32.totalorder %v566_v57, 0 }
  0xbe   :  { %vm795_vm13 = vcmp.gt.s32.totalorder %v794_v2, 0  ;;  %v651_v58 = vor.u32 %v650_v13, %v649_v23  ;;  %v654_v3 = vshll.u32 %v653_v27, 23  ;;  %v740_v55 = vadd.s32 %v739_v63, %v735_v42 }
  0xbf   :  { %v796_v41 = vsel %vm795_vm13, %v794_v2, 0  ;;  %vm571_vm0 = vcmp.eq.s32.totalorder %v566_v57, 2  ;;  %v3013_v61 = vand.u32 3, %v669_v59  ;;  %v888_v32 = vand.u32 2147483647, %v3011_v4 }
  0xc0   :  { %v798_v8 = vand.u32 31, %v796_v41  ;;  %v655_v12 = vor.u32 4788187, %v654_v3  ;;  %v658_v5 = vcvt.s32.f32 %v651_v58  ;;  %v741_v40 = vadd.s32 536870912, %v740_v55 }
  0xc1   :  { %v2283_v11 = vpop.eup %2282  ;;  %v891_v34 = vand.u32 2139095040, %v3011_v4  ;;  %v792_v62 = vor.u32 8388608, %v791_v52  ;;  %v797_v42 = vshrl.u32 %v796_v41, 5  ;;  %vm682_vm2 = vcmp.lt.s32.totalorder %v2838_v19, 0 }
  0xc2   :  { %v2285_v28 = vpop.eup %2284  ;;  %v572_v1 = vxor.u32 2147483648, %v2283_v11  ;;  %v799_v22 = vsub.s32 32, %v798_v8  ;;  %v656_v38 = vand.u32 2147483647, %v655_v12  ;;  %v3017_v17 = vshrl.u32 %v741_v40, 30 }
  0xc3   :  { %v569_v36 = vxor.u32 2147483648, %v2285_v28  ;;  %v801_v30 = vshll.u32 %v2410_v31, %v798_v8  ;;  %v804_v26 = vshll.u32 %v2411_v33, %v798_v8  ;;  %v807_v9 = vshll.u32 %v2412_v35, %v798_v8 }
  0xc4   :  { %v573_v14 = vsel %vm571_vm0, %v572_v1, %v2285_v28  ;;  %v802_v24 = vshrl.u32 %v2411_v33, %v799_v22  ;;  %v659_v7 = vmul.f32 %v658_v5, %v656_v38  ;;  %v743_v16 = vshll.u32 %v3017_v17, 30 }
  0xc5   :  { %v570_v43 = vsel %vm568_vm15, %v2283_v11, %v569_v36  ;;  %v805_v60 = vshrl.u32 %v2412_v35, %v799_v22  ;;  %v808_v51 = vshrl.u32 %v2413_v37, %v799_v22  ;;  %v892_v48 = vshrl.u32 %v891_v34, 23 }
  0xc6   :  { %v574_v10 = vsel %vm567_vm14, %v570_v43, %v573_v14  ;;  %v660_v6 = vxor.u32 2147483648, %v659_v7  ;;  %v3031_v49 = vsub.s32 %v740_v55, %v743_v16  ;;  %v800_v44 = vshrl.u32 %v2410_v31, %v799_v22 }
  0xc7   :  { %v575_v46 = vsel %vm564_vm12, nan, %v574_v10  ;;  %v803_v23 = vor.u32 %v802_v24, %v801_v30  ;;  %v810_v0 = vshll.u32 %v2413_v37, %v798_v8  ;;  %v806_v2 = vor.u32 %v805_v60, %v804_v26 }
  0xc8   :  { %v1965_v15 = vrot.slane %v575_v46, %v2617_v25  ;;  %v661_v56 = vsel %vm578_vm9, %v660_v6, %v659_v7  ;;  %v746_v57 = vsub.s32 0, %v3031_v49  ;;  %v811_v29 = vshrl.u32 %v2414_v39, %v799_v22 }
  0xc9   :  { %v664_v13 = vsel %vm2943_vm7, %v2766_v18, %v661_v56  ;;  %v809_v27 = vor.u32 %v808_v51, %v807_v9  ;;  %v813_v59 = vshll.u32 %v2414_v39, %v798_v8  ;;  %v814_v63 = vshrl.u32 %v2415_v47, %v799_v22 }
  0xca   :  { %2034 = vst [vmem:[#allocation7 + $0x80] sm:$0xff] %v1965_v15  ;;  %2035 = vst [vmem:[#allocation7 + $0x90] sm:$0xff] %v1965_v15  ;;  %2286 = vcosq.f32 %v664_v13  ;;  %v2133_v52 = vmin.u32 %v746_v57, %v3031_v49  ;;  %v812_v58 = vor.u32 %v811_v29, %v810_v0  ;;  %vm816_vm1 = vcmp.lt.s32.totalorder %v797_v42, 1 }
  0xcb   :  { %2288 = vsinq.f32 %v664_v13  ;;  %v815_v3 = vor.u32 %v814_v63, %v813_v59  ;;  %v832_v55 = vshll.u32 %v792_v62, 8  ;;  %v2140_v41 = vadd.s32 4294967169, %v892_v48 }
  0xcc   :  { %v736_v54 = vadd.s32 %v2987_v21, %v2998_v50  ;;  %v748_v11 = vclz %v2133_v52  ;;  %vm818_vm3 = vcmp.lt.s32.totalorder %v797_v42, 3  ;;  %v895_v8 = vand.u32 8388607, %v888_v32 }
  0xcd   :  { %vm817_vm4 = vcmp.lt.s32.totalorder %v797_v42, 2  ;;  %vm819_vm5 = vcmp.lt.s32.totalorder %v797_v42, 4  ;;  %v820_v12 = vsel %vm816_vm1, %v800_v44, %v803_v23  ;;  %v824_v5 = vsel %vm816_vm1, %v803_v23, %v806_v2 }
  0xce   :  { %v2134_v40 = vadd.s32 4294967294, %v748_v11  ;;  %v821_v28 = vsel %vm819_vm5, %v809_v27, 2102212464  ;;  %v825_v1 = vsel %vm819_vm5, %v812_v58, 920167782  ;;  %v828_v22 = vsel %vm816_vm1, %v806_v2, %v809_v27 }
  0xcf   :  { %v822_v34 = vsel %vm818_vm3, %v806_v2, %v821_v28  ;;  %v826_v21 = vsel %vm818_vm3, %v809_v27, %v825_v1  ;;  %v829_v50 = vsel %vm819_vm5, %v815_v3, 1326507024  ;;  %v898_v36 = vadd.s32 1, %v2140_v41 }
  0xd0   :  { %vm2135_vm6 = vcmp.lt.s32.totalorder %v2134_v40, 0  ;;  %v766_v38 = vsub.s32 4, %v3017_v17  ;;  %v827_v62 = vsel %vm817_vm4, %v824_v5, %v826_v21  ;;  %v830_v14 = vsel %vm818_vm3, %v812_v58, %v829_v50  ;;  %v3105_v50 = vld [vmem:[#allocation2 + $0x9] sm:$0x1] }
  0xd1   :  { %v751_v30 = vsel %vm2135_vm6, 0, %v2134_v40  ;;  %v831_v24 = vsel %vm817_vm4, %v828_v22, %v830_v14  ;;  %v3060_v26 = vmul.u32.u64.low %v832_v55, %v827_v62  ;;  %v3061_v43 = vmul.u32.u64.high %v832_v55, %v827_v62, %v3060_v26 }
  0xd2   :  { %vm668_vm7 = vweird.f32 %v2766_v18  ;;  %v752_v7 = vsub.s32 32, %v751_v30  ;;  %v753_v16 = vshll.u32 %v3031_v49, %v751_v30  ;;  %v756_v60 = vsub.s32 4294967266, %v751_v30 }
  0xd3   :  { %v823_v10 = vsel %vm817_vm4, %v820_v12, %v822_v34  ;;  %vm3069_vm8 = vcmp.le.f32.partialorder %v680_v53, 0.7853982  ;;  %v3073_v51 = vmul.u32.u64.low %v832_v55, %v831_v24  ;;  %v3074_v48 = vmul.u32.u64.high %v832_v55, %v831_v24, %v3073_v51 }
  0xd4   :  { %vm899_vm9 = vcmp.gt.s32.totalorder %v898_v36, 0  ;;  %v754_v46 = vshrl.u32 %v736_v54, %v752_v7  ;;  %v757_v6 = vadd.s32 127, %v756_v60  ;;  %v3079_v15 = vsel %vm682_vm2, %v766_v38, %v3017_v17 }
  0xd5   :  { %v900_v49 = vsel %vm899_vm9, %v898_v36, 0  ;;  %v839_v42 = vmul.u32 %v832_v55, %v823_v10  ;;  %v842_v44 = vadd.s32 1, %v3061_v43  ;;  %v896_v23 = vor.u32 8388608, %v895_v8 }
  0xd6   :  { %v902_v53 = vand.u32 31, %v900_v49  ;;  %vm671_vm10 = vcmp.lt.s32.totalorder %v3013_v61, 2  ;;  %vm672_vm11 = vcmp.eq.s32.totalorder %v3013_v61, 0  ;;  %v755_v0 = vor.u32 %v754_v46, %v753_v16 }
  0xd7   :  { %v758_v56 = vshll.u32 %v757_v6, 23  ;;  %v2287_v57 = vpop.eup %2286  ;;  %vm675_vm12 = vcmp.eq.s32.totalorder %v3013_v61, 2  ;;  %v769_v17 = vsel %vm3069_vm8, 0, %v3079_v15  ;;  %vm841_vm13 = vc.u32 %v3074_v48, %v3060_v26 }
  0xd8   :  { %v903_v2 = vsub.s32 32, %v902_v53  ;;  %v2289_v29 = vpop.eup %2288  ;;  %v676_v13 = vxor.u32 2147483648, %v2287_v57  ;;  %v762_v59 = vcvt.s32.f32 %v755_v0  ;;  %v843_v63 = vsel %vm841_vm13, %v842_v44, %v3061_v43 }
  0xd9   :  { %v759_v27 = vor.u32 4788187, %v758_v56  ;;  %v673_v52 = vxor.u32 2147483648, %v2289_v29  ;;  %v844_v58 = vadd.s32 %v843_v63, %v839_v42  ;;  %v3091_v3 = vshrl.u32 %v900_v49, 5 }
  0xda   :  { %v3093_v55 = vshll.u32 %v896_v23, 8  ;;  %v677_v41 = vsel %vm675_vm12, %v676_v13, %v2289_v29  ;;  %v905_v11 = vshll.u32 %v2410_v31, %v902_v53  ;;  %v906_v8 = vshrl.u32 %v2411_v33, %v903_v2 }
  0xdb   :  { %v760_v54 = vand.u32 2147483647, %v759_v27  ;;  %v674_v12 = vsel %vm672_vm11, %v2287_v57, %v673_v52  ;;  %v845_v5 = vadd.s32 536870912, %v844_v58  ;;  %v908_v40 = vshll.u32 %v2411_v33, %v902_v53 }
  0xdc   :  { %v909_v28 = vshrl.u32 %v2412_v35, %v903_v2  ;;  %v678_v1 = vsel %vm671_vm10, %v674_v12, %v677_v41  ;;  %v911_v34 = vshll.u32 %v2412_v35, %v902_v53  ;;  %v912_v21 = vshrl.u32 %v2413_v37, %v903_v2 }
  0xdd   :  { %v763_v22 = vmul.f32 %v762_v59, %v760_v54  ;;  %v679_v36 = vsel %vm668_vm7, nan, %v678_v1  ;;  %v846_v38 = vshrl.u32 %v845_v5, 30  ;;  %v914_v62 = vshll.u32 %v2413_v37, %v902_v53 }
  0xde   :  { %v915_v14 = vshrl.u32 %v2414_v39, %v903_v2  ;;  %v1969_v30 = vrot.slane %v679_v36, %v2617_v25  ;;  %v917_v61 = vshll.u32 %v2414_v39, %v902_v53  ;;  %v992_v43 = vand.u32 2147483647, %v3105_v50 }
  0xdf   :  { %v764_v24 = vxor.u32 2147483648, %v763_v22  ;;  %v847_v7 = vshll.u32 %v846_v38, 30  ;;  %v904_v16 = vshrl.u32 %v2410_v31, %v903_v2  ;;  %v918_v60 = vshrl.u32 %v2415_v47, %v903_v2 }
  0xe0   :  { %v995_v18 = vand.u32 2139095040, %v3105_v50  ;;  %2036 = vst [vmem:[#allocation7 + $0xa0] sm:$0xff] %v1969_v30  ;;  %2037 = vst [vmem:[#allocation7 + $0xb0] sm:$0xff] %v1969_v30  ;;  %v907_v51 = vor.u32 %v906_v8, %v905_v11  ;;  %v910_v46 = vor.u32 %v909_v28, %v908_v40  ;;  %v916_v6 = vor.u32 %v915_v14, %v914_v62 }
  0xe1   :  { %v765_v10 = vsel %vm682_vm2, %v764_v24, %v763_v22  ;;  %v3122_v49 = vsub.s32 %v844_v58, %v847_v7  ;;  %v913_v42 = vor.u32 %v912_v21, %v911_v34  ;;  %vm920_vm14 = vcmp.lt.s32.totalorder %v3091_v3, 1 }
  0xe2   :  { %v768_v15 = vsel %vm3069_vm8, %v2838_v19, %v765_v10  ;;  %v919_v44 = vor.u32 %v918_v60, %v917_v61  ;;  %vm922_vm15 = vcmp.lt.s32.totalorder %v3091_v3, 3  ;;  %vm923_vm0 = vcmp.lt.s32.totalorder %v3091_v3, 4  ;;  %v3179_v10 = vld [vmem:[#allocation2 + $0xa] sm:$0x1] }
  0xe3   :  { %2290 = vcosq.f32 %v768_v15  ;;  %v850_v23 = vsub.s32 0, %v3122_v49  ;;  %vm921_vm1 = vcmp.lt.s32.totalorder %v3091_v3, 2  ;;  %v925_v53 = vsel %vm923_vm0, %v913_v42, 2102212464 }
  0xe4   :  { %2292 = vsinq.f32 %v768_v15  ;;  %v924_v9 = vsel %vm920_vm14, %v904_v16, %v907_v51  ;;  %v926_v0 = vsel %vm922_vm15, %v910_v46, %v925_v53  ;;  %v928_v56 = vsel %vm920_vm14, %v907_v51, %v910_v46 }
  0xe5   :  { %v929_v57 = vsel %vm923_vm0, %v916_v6, 920167782  ;;  %v773_v2 = vadd.s32 3, %v769_v17  ;;  %v2137_v29 = vmin.u32 %v850_v23, %v3122_v49  ;;  %v932_v59 = vsel %vm920_vm14, %v910_v46, %v913_v42 }
  0xe6   :  { %v930_v13 = vsel %vm922_vm15, %v913_v42, %v929_v57  ;;  %v933_v63 = vsel %vm923_vm0, %v919_v44, 1326507024  ;;  %v996_v52 = vshrl.u32 %v995_v18, 23  ;;  %v870_v41 = vsub.s32 4, %v846_v38 }
  0xe7   :  { %v931_v27 = vsel %vm921_vm1, %v928_v56, %v930_v13  ;;  %v852_v58 = vclz %v2137_v29  ;;  %v927_v54 = vsel %vm921_vm1, %v924_v9, %v926_v0  ;;  %v999_v17 = vand.u32 8388607, %v992_v43 }
  0xe8   :  { %v934_v11 = vsel %vm922_vm15, %v916_v6, %v933_v63  ;;  %v3149_v8 = vmul.u32.u64.low %v3093_v55, %v931_v27  ;;  %v3150_v12 = vmul.u32.u64.high %v3093_v55, %v931_v27, %v3149_v8  ;;  %v2144_v5 = vadd.s32 4294967169, %v996_v52 }
  0xe9   :  { %vm3155_vm2 = vcmp.le.f32.partialorder %v784_v45, 0.7853982  ;;  %vm786_vm3 = vcmp.lt.s32.totalorder %v2949_v20, 0  ;;  %v2138_v28 = vadd.s32 4294967294, %v852_v58  ;;  %v935_v1 = vsel %vm921_vm1, %v932_v59, %v934_v11 }
  0xea   :  { %vm772_vm4 = vweird.f32 %v2838_v19  ;;  %v774_v22 = vand.u32 3, %v773_v2  ;;  %v3164_v34 = vmul.u32.u64.low %v3093_v55, %v935_v1  ;;  %v3165_v21 = vmul.u32.u64.high %v3093_v55, %v935_v1, %v3164_v34 }
  0xeb   :  { %v1002_v36 = vadd.s32 1, %v2144_v5  ;;  %v840_v45 = vadd.s32 %v3060_v26, %v3074_v48  ;;  %vm2139_vm5 = vcmp.lt.s32.totalorder %v2138_v28, 0  ;;  %v3171_v62 = vsel %vm786_vm3, %v870_v41, %v846_v38 }
  0xec   :  { %v943_v14 = vmul.u32 %v3093_v55, %v927_v54  ;;  %v855_v3 = vsel %vm2139_vm5, 0, %v2138_v28  ;;  %v946_v30 = vadd.s32 1, %v3150_v12  ;;  %v1000_v24 = vor.u32 8388608, %v999_v17 }
  0xed   :  { %vm1003_vm6 = vcmp.gt.s32.totalorder %v1002_v36, 0  ;;  %v856_v61 = vsub.s32 32, %v855_v3  ;;  %v857_v7 = vshll.u32 %v3122_v49, %v855_v3  ;;  %v860_v16 = vsub.s32 4294967266, %v855_v3 }
  0xee   :  { %v1004_v60 = vsel %vm1003_vm6, %v1002_v36, 0  ;;  %vm775_vm7 = vcmp.lt.s32.totalorder %v774_v22, 2  ;;  %vm776_vm8 = vcmp.eq.s32.totalorder %v774_v22, 0  ;;  %vm945_vm9 = vc.u32 %v3165_v21, %v3149_v8 }
  0xef   :  { %v1006_v26 = vand.u32 31, %v1004_v60  ;;  %vm779_vm10 = vcmp.eq.s32.totalorder %v774_v22, 2  ;;  %v858_v38 = vshrl.u32 %v840_v45, %v856_v61  ;;  %v861_v55 = vadd.s32 127, %v860_v16 }
  0xf0   :  { %v2291_v48 = vpop.eup %2290  ;;  %v947_v18 = vsel %vm945_vm9, %v946_v30, %v3150_v12  ;;  %v873_v6 = vsel %vm3155_vm2, 0, %v3171_v62  ;;  %v3184_v53 = vshll.u32 %v1000_v24, 8  ;;  %v3186_v56 = vshrl.u32 %v1004_v60, 5 }
  0xf1   :  { %v2293_v51 = vpop.eup %2292  ;;  %v780_v46 = vxor.u32 2147483648, %v2291_v48  ;;  %v948_v15 = vadd.s32 %v947_v18, %v943_v14  ;;  %v1007_v49 = vsub.s32 32, %v1006_v26  ;;  %v859_v44 = vor.u32 %v858_v38, %v857_v7 }
  0xf2   :  { %v777_v42 = vxor.u32 2147483648, %v2293_v51  ;;  %v862_v23 = vshll.u32 %v861_v55, 23  ;;  %v1099_v57 = vand.u32 2139095040, %v3179_v10  ;;  %v1009_v27 = vshll.u32 %v2410_v31, %v1006_v26 }
  0xf3   :  { %v781_v9 = vsel %vm779_vm10, %v780_v46, %v2293_v51  ;;  %v949_v0 = vadd.s32 536870912, %v948_v15  ;;  %v866_v13 = vcvt.s32.f32 %v859_v44  ;;  %v1010_v52 = vshrl.u32 %v2411_v33, %v1007_v49 }
  0xf4   :  { %v778_v2 = vsel %vm776_vm8, %v2291_v48, %v777_v42  ;;  %v863_v29 = vor.u32 4788187, %v862_v23  ;;  %v1012_v58 = vshll.u32 %v2411_v33, %v1006_v26  ;;  %v1013_v17 = vshrl.u32 %v2412_v35, %v1007_v49 }
  0xf5   :  { %v782_v59 = vsel %vm775_vm7, %v778_v2, %v781_v9  ;;  %v950_v63 = vshrl.u32 %v949_v0, 30  ;;  %v1015_v11 = vshll.u32 %v2412_v35, %v1006_v26  ;;  %vm890_vm11 = vcmp.lt.s32.totalorder %v3011_v4, 0 }
  0xf6   :  { %v783_v41 = vsel %vm772_vm4, nan, %v782_v59  ;;  %v864_v54 = vand.u32 2147483647, %v863_v29  ;;  %v1016_v28 = vshrl.u32 %v2413_v37, %v1007_v49  ;;  %v1018_v1 = vshll.u32 %v2413_v37, %v1006_v26 }
  0xf7   :  { %v1973_v12 = vrot.slane %v783_v41, %v2617_v25  ;;  %v951_v5 = vshll.u32 %v950_v63, 30  ;;  %v1019_v34 = vshrl.u32 %v2414_v39, %v1007_v49  ;;  %v1021_v19 = vshll.u32 %v2414_v39, %v1006_v26 }
  0xf8   :  { %v867_v22 = vmul.f32 %v866_v13, %v864_v54  ;;  %v1100_v36 = vshrl.u32 %v1099_v57, 23  ;;  %v1008_v14 = vshrl.u32 %v2410_v31, %v1007_v49  ;;  %v1011_v3 = vor.u32 %v1010_v52, %v1009_v27 }
  0xf9   :  { %2038 = vst [vmem:[#allocation7 + $0xc0] sm:$0xff] %v1973_v12  ;;  %2039 = vst [vmem:[#allocation7 + $0xd0] sm:$0xff] %v1973_v12  ;;  %v3204_v45 = vsub.s32 %v948_v15, %v951_v5  ;;  %v1022_v30 = vshrl.u32 %v2415_v47, %v1007_v49  ;;  %v974_v61 = vsub.s32 4, %v950_v63  ;;  %v1014_v7 = vor.u32 %v1013_v17, %v1012_v58 }
  0xfa   :  { %v868_v24 = vxor.u32 2147483648, %v867_v22  ;;  %v1020_v16 = vor.u32 %v1019_v34, %v1018_v1  ;;  %v1017_v48 = vor.u32 %v1016_v28, %v1015_v11  ;;  %vm1024_vm12 = vcmp.lt.s32.totalorder %v3186_v56, 1 }
  0xfb   :  { %v954_v60 = vsub.s32 0, %v3204_v45  ;;  %vm1025_vm13 = vcmp.lt.s32.totalorder %v3186_v56, 2  ;;  %v1023_v38 = vor.u32 %v1022_v30, %v1021_v19  ;;  %vm1026_vm14 = vcmp.lt.s32.totalorder %v3186_v56, 3  ;;  %v3274_v19 = vld [vmem:[#allocation2 + $0xb] sm:$0x1] }
  0xfc   :  { %v869_v26 = vsel %vm786_vm3, %v868_v24, %v867_v22  ;;  %vm1027_vm15 = vcmp.lt.s32.totalorder %v3186_v56, 4  ;;  %v1028_v51 = vsel %vm1024_vm12, %v1008_v14, %v1011_v3  ;;  %v1032_v49 = vsel %vm1024_vm12, %v1011_v3, %v1014_v7 }
  0xfd   :  { %v872_v55 = vsel %vm3155_vm2, %v2949_v20, %v869_v26  ;;  %v2141_v18 = vmin.u32 %v954_v60, %v3204_v45  ;;  %v1029_v46 = vsel %vm1027_vm15, %v1017_v48, 2102212464  ;;  %v1033_v42 = vsel %vm1027_vm15, %v1020_v16, 920167782 }
  0xfe   :  { %2294 = vcosq.f32 %v872_v55  ;;  %v1030_v15 = vsel %vm1026_vm14, %v1014_v7, %v1029_v46  ;;  %vm3231_vm0 = vcmp.le.f32.partialorder %v888_v32, 0.7853982  ;;  %v1036_v9 = vsel %vm1024_vm12, %v1014_v7, %v1017_v48 }
  0xff   :  { %2296 = vsinq.f32 %v872_v55  ;;  %v956_v23 = vclz %v2141_v18  ;;  %v877_v0 = vadd.s32 3, %v873_v6  ;;  %v975_v57 = vsel %vm890_vm11, %v974_v61, %v950_v63 }
 0x100   :  { %v1034_v2 = vsel %vm1026_vm14, %v1017_v48, %v1033_v42  ;;  %v1037_v32 = vsel %vm1027_vm15, %v1023_v38, 1326507024  ;;  %v1031_v13 = vsel %vm1025_vm13, %v1028_v51, %v1030_v15  ;;  %v2148_v63 = vadd.s32 4294967169, %v1100_v36 }
 0x101   :  { %v2142_v29 = vadd.s32 4294967294, %v956_v23  ;;  %v1035_v27 = vsel %vm1025_vm13, %v1032_v49, %v1034_v2  ;;  %v1038_v40 = vsel %vm1026_vm14, %v1020_v16, %v1037_v32  ;;  %v944_v52 = vadd.s32 %v3149_v8, %v3165_v21 }
 0x102   :  { %v1039_v62 = vsel %vm1025_vm13, %v1036_v9, %v1038_v40  ;;  %v3256_v6 = vmul.u32.u64.low %v3184_v53, %v1035_v27  ;;  %v3257_v59 = vmul.u32.u64.high %v3184_v53, %v1035_v27, %v3256_v6  ;;  %v977_v17 = vsel %vm3231_vm0, 0, %v975_v57 }
 0x103   :  { %vm2143_vm1 = vcmp.lt.s32.totalorder %v2142_v29, 0  ;;  %v3263_v58 = vmul.u32.u64.low %v3184_v53, %v1039_v62  ;;  %v3264_v41 = vmul.u32.u64.high %v3184_v53, %v1039_v62, %v3263_v58  ;;  %v1096_v56 = vand.u32 2147483647, %v3179_v10 }
 0x104   :  { %v959_v54 = vsel %vm2143_vm1, 0, %v2142_v29  ;;  %v1106_v11 = vadd.s32 1, %v2148_v63  ;;  %v1047_v1 = vmul.u32 %v3184_v53, %v1031_v13  ;;  %v878_v22 = vand.u32 3, %v877_v0 }
 0x105   :  { %v960_v12 = vsub.s32 32, %v959_v54  ;;  %v961_v5 = vshll.u32 %v3204_v45, %v959_v54  ;;  %v964_v28 = vsub.s32 4294967266, %v959_v54  ;;  %v1050_v8 = vadd.s32 1, %v3257_v59 }
 0x106   :  { %vm1107_vm2 = vcmp.gt.s32.totalorder %v1106_v11, 0  ;;  %vm1049_vm3 = vc.u32 %v3264_v41, %v3256_v6  ;;  %vm876_vm4 = vweird.f32 %v2949_v20  ;;  %v981_v36 = vadd.s32 3, %v977_v17 }
 0x107   :  { %v962_v21 = vshrl.u32 %v944_v52, %v960_v12  ;;  %v965_v34 = vadd.s32 127, %v964_v28  ;;  %v1051_v14 = vsel %vm1049_vm3, %v1050_v8, %v3257_v59  ;;  %v1108_v45 = vsel %vm1107_vm2, %v1106_v11, 0 }
 0x108   :  { %v1052_v53 = vadd.s32 %v1051_v14, %v1047_v1  ;;  %v1103_v24 = vand.u32 8388607, %v1096_v56  ;;  %vm879_vm5 = vcmp.lt.s32.totalorder %v878_v22, 2  ;;  %v3280_v61 = vshrl.u32 %v1108_v45, 5 }
 0x109   :  { %v963_v3 = vor.u32 %v962_v21, %v961_v5  ;;  %v966_v30 = vshll.u32 %v965_v34, 23  ;;  %v1110_v7 = vand.u32 31, %v1108_v45  ;;  %v1203_v16 = vand.u32 2139095040, %v3274_v19 }
 0x10a   :  { %vm883_vm6 = vcmp.eq.s32.totalorder %v878_v22, 2  ;;  %v1053_v38 = vadd.s32 536870912, %v1052_v53  ;;  %vm880_vm7 = vcmp.eq.s32.totalorder %v878_v22, 0  ;;  %v3283_v51 = vand.u32 3, %v981_v36 }
 0x10b   :  { %v2295_v60 = vpop.eup %2294  ;;  %v967_v48 = vor.u32 4788187, %v966_v30  ;;  %v970_v26 = vcvt.s32.f32 %v963_v3  ;;  %v1111_v46 = vsub.s32 32, %v1110_v7  ;;  %v1104_v23 = vor.u32 8388608, %v1103_v24 }
 0x10c   :  { %v2297_v55 = vpop.eup %2296  ;;  %v884_v18 = vxor.u32 2147483648, %v2295_v60  ;;  %v1054_v42 = vshrl.u32 %v1053_v38, 30  ;;  %v1113_v0 = vshll.u32 %v2410_v31, %v1110_v7  ;;  %vm1128_vm8 = vcmp.lt.s32.totalorder %v3280_v61, 1 }
 0x10d   :  { %v881_v15 = vxor.u32 2147483648, %v2297_v55  ;;  %v968_v49 = vand.u32 2147483647, %v967_v48  ;;  %v1204_v57 = vshrl.u32 %v1203_v16, 23  ;;  %v1114_v13 = vshrl.u32 %v2411_v33, %v1111_v46 }
 0x10e   :  { %v885_v9 = vsel %vm883_vm6, %v884_v18, %v2297_v55  ;;  %v1055_v29 = vshll.u32 %v1054_v42, 30  ;;  %v1116_v40 = vshll.u32 %v2411_v33, %v1110_v7  ;;  %v1117_v62 = vshrl.u32 %v2412_v35, %v1111_v46 }
 0x10f   :  { %v882_v2 = vsel %vm880_vm7, %v2295_v60, %v881_v15  ;;  %v971_v32 = vmul.f32 %v970_v26, %v968_v49  ;;  %v1119_v59 = vshll.u32 %v2412_v35, %v1110_v7  ;;  %vm994_vm9 = vcmp.lt.s32.totalorder %v3105_v50, 0 }
 0x110   :  { %v886_v27 = vsel %vm879_vm5, %v882_v2, %v885_v9  ;;  %v3295_v58 = vsub.s32 %v1052_v53, %v1055_v29  ;;  %v1120_v54 = vshrl.u32 %v2413_v37, %v1111_v46  ;;  %v1078_v11 = vsub.s32 4, %v1054_v42 }
 0x111   :  { %v887_v63 = vsel %vm876_vm4, nan, %v886_v27  ;;  %v972_v52 = vxor.u32 2147483648, %v971_v32  ;;  %v1112_v12 = vshrl.u32 %v2410_v31, %v1111_v46  ;;  %v1122_v5 = vshll.u32 %v2413_v37, %v1110_v7 }
 0x112   :  { %v1977_v17 = vrot.slane %v887_v63, %v2617_v25  ;;  %v1058_v20 = vsub.s32 0, %v3295_v58  ;;  %v1115_v1 = vor.u32 %v1114_v13, %v1113_v0  ;;  %v1123_v22 = vshrl.u32 %v2414_v39, %v1111_v46 }
 0x113   :  { %v973_v28 = vsel %vm890_vm11, %v972_v52, %v971_v32  ;;  %v1118_v21 = vor.u32 %v1117_v62, %v1116_v40  ;;  %v1125_v34 = vshll.u32 %v2414_v39, %v1110_v7  ;;  %v1126_v36 = vshrl.u32 %v2415_v47, %v1111_v46 }
 0x114   :  { %2040 = vst [vmem:[#allocation7 + $0xe0] sm:$0xff] %v1977_v17  ;;  %2041 = vst [vmem:[#allocation7 + $0xf0] sm:$0xff] %v1977_v17  ;;  %v976_v8 = vsel %vm3231_vm0, %v3011_v4, %v973_v28  ;;  %vm3312_vm10 = vcmp.le.f32.partialorder %v992_v43, 0.7853982  ;;  %v2145_v45 = vmin.u32 %v1058_v20, %v3295_v58  ;;  %v1121_v3 = vor.u32 %v1120_v54, %v1119_v59 }
 0x115   :  { %2298 = vcosq.f32 %v976_v8  ;;  %v1124_v30 = vor.u32 %v1123_v22, %v1122_v5  ;;  %v1127_v53 = vor.u32 %v1126_v36, %v1125_v34  ;;  %vm1130_vm11 = vcmp.lt.s32.totalorder %v3280_v61, 3 }
 0x116   :  { %2300 = vsinq.f32 %v976_v8  ;;  %vm1131_vm12 = vcmp.lt.s32.totalorder %v3280_v61, 4  ;;  %v1048_v44 = vadd.s32 %v3256_v6, %v3264_v41  ;;  %v1060_v24 = vclz %v2145_v45 }
 0x117   :  { %vm1129_vm13 = vcmp.lt.s32.totalorder %v3280_v61, 2  ;;  %v1144_v43 = vshll.u32 %v1104_v23, 8  ;;  %v1132_v7 = vsel %vm1128_vm8, %v1112_v12, %v1115_v1  ;;  %v1133_v16 = vsel %vm1131_vm12, %v1121_v3, 2102212464 }
 0x118   :  { %v1136_v60 = vsel %vm1128_vm8, %v1115_v1, %v1118_v21  ;;  %v1137_v48 = vsel %vm1131_vm12, %v1124_v30, 920167782  ;;  %v2146_v26 = vadd.s32 4294967294, %v1060_v24  ;;  %v1134_v38 = vsel %vm1130_vm11, %v1118_v21, %v1133_v16 }
 0x119   :  { %v1138_v55 = vsel %vm1130_vm11, %v1121_v3, %v1137_v48  ;;  %v1140_v6 = vsel %vm1128_vm8, %v1118_v21, %v1121_v3  ;;  %v1079_v41 = vsel %vm994_vm9, %v1078_v11, %v1054_v42  ;;  %v1141_v46 = vsel %vm1131_vm12, %v1127_v53, 1326507024 }
 0x11a   :  { %v1139_v18 = vsel %vm1129_vm13, %v1136_v60, %v1138_v55  ;;  %v2152_v15 = vadd.s32 4294967169, %v1204_v57  ;;  %vm2147_vm14 = vcmp.lt.s32.totalorder %v2146_v26, 0  ;;  %v1142_v49 = vsel %vm1130_vm11, %v1124_v30, %v1141_v46 }
 0x11b   :  { %v3338_v23 = vmul.u32.u64.low %v1144_v43, %v1139_v18  ;;  %v3339_v9 = vmul.u32.u64.high %v1144_v43, %v1139_v18, %v3338_v23  ;;  %v1063_v0 = vsel %vm2147_vm14, 0, %v2146_v26  ;;  %v1135_v2 = vsel %vm1129_vm13, %v1132_v7, %v1134_v38  ;;  %v3371_v26 = vld [vmem:[#allocation2 + $0xc] sm:$0x1] }
 0x11c   :  { %v1143_v42 = vsel %vm1129_vm13, %v1140_v6, %v1142_v49  ;;  %v1200_v32 = vand.u32 2147483647, %v3274_v19  ;;  %v1064_v29 = vsub.s32 32, %v1063_v0  ;;  %v1065_v57 = vshll.u32 %v3295_v58, %v1063_v0 }
 0x11d   :  { %v1068_v13 = vsub.s32 4294967266, %v1063_v0  ;;  %v1210_v27 = vadd.s32 1, %v2152_v15  ;;  %v1081_v40 = vsel %vm3312_vm10, 0, %v1079_v41  ;;  %v1154_v54 = vadd.s32 1, %v3339_v9 }
 0x11e   :  { %v3350_v62 = vmul.u32.u64.low %v1144_v43, %v1143_v42  ;;  %v3351_v59 = vmul.u32.u64.high %v1144_v43, %v1143_v42, %v3350_v62  ;;  %v1066_v63 = vshrl.u32 %v1048_v44, %v1064_v29  ;;  %vm980_vm0 = vweird.f32 %v3011_v4 }
 0x11f   :  { %v1069_v52 = vadd.s32 127, %v1068_v13  ;;  %vm1211_vm15 = vcmp.gt.s32.totalorder %v1210_v27, 0  ;;  %v1151_v61 = vmul.u32 %v1144_v43, %v1135_v2  ;;  %v1207_v17 = vand.u32 8388607, %v1200_v32 }
 0x120   :  { %v1212_v58 = vsel %vm1211_vm15, %v1210_v27, 0  ;;  %vm983_vm1 = vcmp.lt.s32.totalorder %v3283_v51, 2  ;;  %v1067_v11 = vor.u32 %v1066_v63, %v1065_v57  ;;  %vm984_vm2 = vcmp.eq.s32.totalorder %v3283_v51, 0 }
 0x121   :  { %v1070_v12 = vshll.u32 %v1069_v52, 23  ;;  %v1214_v5 = vand.u32 31, %v1212_v58  ;;  %vm987_vm3 = vcmp.eq.s32.totalorder %v3283_v51, 2  ;;  %v3360_v20 = vadd.s32 3, %v1081_v40 }
 0x122   :  { %v2299_v28 = vpop.eup %2298  ;;  %vm1153_vm4 = vc.u32 %v3351_v59, %v3338_v23  ;;  %v1074_v21 = vcvt.s32.f32 %v1067_v11  ;;  %v1208_v3 = vor.u32 8388608, %v1207_v17  ;;  %v1213_v15 = vshrl.u32 %v1212_v58, 5 }
 0x123   :  { %v2301_v1 = vpop.eup %2300  ;;  %v988_v22 = vxor.u32 2147483648, %v2299_v28  ;;  %v1071_v8 = vor.u32 4788187, %v1070_v12  ;;  %v1155_v34 = vsel %vm1153_vm4, %v1154_v54, %v3339_v9  ;;  %v1215_v30 = vsub.s32 32, %v1214_v5 }
 0x124   :  { %v985_v36 = vxor.u32 2147483648, %v2301_v1  ;;  %v1156_v45 = vadd.s32 %v1155_v34, %v1151_v61  ;;  %v1217_v24 = vshll.u32 %v2410_v31, %v1214_v5  ;;  %v1220_v43 = vshll.u32 %v2411_v33, %v1214_v5 }
 0x125   :  { %v989_v53 = vsel %vm987_vm3, %v988_v22, %v2301_v1  ;;  %v1072_v44 = vand.u32 2147483647, %v1071_v8  ;;  %v1218_v60 = vshrl.u32 %v2411_v33, %v1215_v30  ;;  %v1223_v48 = vshll.u32 %v2412_v35, %v1214_v5 }
 0x126   :  { %v986_v7 = vsel %vm984_vm2, %v2299_v28, %v985_v36  ;;  %v1157_v16 = vadd.s32 536870912, %v1156_v45  ;;  %v1221_v6 = vshrl.u32 %v2412_v35, %v1215_v30  ;;  %v1224_v41 = vshrl.u32 %v2413_v37, %v1215_v30 }
 0x127   :  { %v990_v38 = vsel %vm983_vm1, %v986_v7, %v989_v53  ;;  %v1075_v55 = vmul.f32 %v1074_v21, %v1072_v44  ;;  %v1226_v49 = vshll.u32 %v2413_v37, %v1214_v5  ;;  %v1216_v2 = vshrl.u32 %v2410_v31, %v1215_v30 }
 0x128   :  { %v991_v18 = vsel %vm980_vm0, nan, %v990_v38  ;;  %v1158_v46 = vshrl.u32 %v1157_v16, 30  ;;  %v1307_v51 = vand.u32 2139095040, %v3371_v26  ;;  %v1219_v29 = vor.u32 %v1218_v60, %v1217_v24 }
 0x129   :  { %v1981_v9 = vrot.slane %v991_v18, %v2617_v25  ;;  %v1076_v0 = vxor.u32 2147483648, %v1075_v55  ;;  %v1227_v57 = vshrl.u32 %v2414_v39, %v1215_v30  ;;  %v1229_v13 = vshll.u32 %v2414_v39, %v1214_v5 }
 0x12a   :  { %v1159_v42 = vshll.u32 %v1158_v46, 30  ;;  %v1222_v27 = vor.u32 %v1221_v6, %v1220_v43  ;;  %v1225_v40 = vor.u32 %v1224_v41, %v1223_v48  ;;  %v1230_v62 = vshrl.u32 %v2415_v47, %v1215_v30 }
 0x12b   :  { %2042 = vst [vmem:[#allocation7 + $0x100] sm:$0xff] %v1981_v9  ;;  %2043 = vst [vmem:[#allocation7 + $0x110] sm:$0xff] %v1981_v9  ;;  %v1077_v4 = vsel %vm994_vm9, %v1076_v0, %v1075_v55  ;;  %v1228_v54 = vor.u32 %v1227_v57, %v1226_v49  ;;  %vm1232_vm5 = vcmp.lt.s32.totalorder %v1213_v15, 1  ;;  %vm1234_vm6 = vcmp.lt.s32.totalorder %v1213_v15, 3 }
 0x12c   :  { %v1080_v63 = vsel %vm3312_vm10, %v3105_v50, %v1077_v4  ;;  %v3391_v52 = vsub.s32 %v1156_v45, %v1159_v42  ;;  %v1231_v61 = vor.u32 %v1230_v62, %v1229_v13  ;;  %v1248_v17 = vshll.u32 %v1208_v3, 8 }
 0x12d   :  { %2302 = vcosq.f32 %v1080_v63  ;;  %vm1233_vm7 = vcmp.lt.s32.totalorder %v1213_v15, 2  ;;  %vm1235_vm8 = vcmp.lt.s32.totalorder %v1213_v15, 4  ;;  %v1182_v11 = vsub.s32 4, %v1158_v46 }
 0x12e   :  { %2304 = vsinq.f32 %v1080_v63  ;;  %v1162_v58 = vsub.s32 0, %v3391_v52  ;;  %v1237_v12 = vsel %vm1235_vm8, %v1225_v40, 2102212464  ;;  %v1240_v5 = vsel %vm1232_vm5, %v1219_v29, %v1222_v27  ;;  %v3436_v63 = vld [vmem:[#allocation2 + $0xd] sm:$0x1] }
 0x12f   :  { %v1241_v28 = vsel %vm1235_vm8, %v1228_v54, 920167782  ;;  %v1236_v1 = vsel %vm1232_vm5, %v1216_v2, %v1219_v29  ;;  %v1308_v8 = vshrl.u32 %v1307_v51, 23  ;;  %v1238_v21 = vsel %vm1234_vm6, %v1222_v27, %v1237_v12 }
 0x130   :  { %v2149_v14 = vmin.u32 %v1162_v58, %v3391_v52  ;;  %v1242_v22 = vsel %vm1234_vm6, %v1225_v40, %v1241_v28  ;;  %v1244_v36 = vsel %vm1232_vm5, %v1222_v27, %v1225_v40  ;;  %v1245_v45 = vsel %vm1235_vm8, %v1231_v61, 1326507024 }
 0x131   :  { %v1243_v34 = vsel %vm1233_vm7, %v1240_v5, %v1242_v22  ;;  %vm1098_vm9 = vcmp.lt.s32.totalorder %v3179_v10, 0  ;;  %v1304_v30 = vand.u32 2147483647, %v3371_v26  ;;  %v1246_v44 = vsel %vm1234_vm6, %v1228_v54, %v1245_v45 }
 0x132   :  { %v1164_v3 = vclz %v2149_v14  ;;  %v1183_v53 = vsel %vm1098_vm9, %v1182_v11, %v1158_v46  ;;  %v3406_v24 = vmul.u32.u64.low %v1248_v17, %v1243_v34  ;;  %v3407_v43 = vmul.u32.u64.high %v1248_v17, %v1243_v34, %v3406_v24 }
 0x133   :  { %v1239_v16 = vsel %vm1233_vm7, %v1236_v1, %v1238_v21  ;;  %v1247_v60 = vsel %vm1233_vm7, %v1244_v36, %v1246_v44  ;;  %v2156_v48 = vadd.s32 4294967169, %v1308_v8  ;;  %vm1084_vm10 = vweird.f32 %v3105_v50 }
 0x134   :  { %v2150_v7 = vadd.s32 4294967294, %v1164_v3  ;;  %v1086_v38 = vand.u32 3, %v3360_v20  ;;  %vm3416_vm11 = vcmp.le.f32.partialorder %v1096_v56, 0.7853982  ;;  %v1152_v18 = vadd.s32 %v3338_v23, %v3351_v59 }
 0x135   :  { %v3420_v6 = vmul.u32.u64.low %v1248_v17, %v1247_v60  ;;  %v3421_v41 = vmul.u32.u64.high %v1248_v17, %v1247_v60, %v3420_v6  ;;  %v1311_v46 = vand.u32 8388607, %v1304_v30  ;;  %v1314_v15 = vadd.s32 1, %v2156_v48 }
 0x136   :  { %vm2151_vm12 = vcmp.lt.s32.totalorder %v2150_v7, 0  ;;  %v1185_v20 = vsel %vm3416_vm11, 0, %v1183_v53  ;;  %v1255_v9 = vmul.u32 %v1248_v17, %v1239_v16  ;;  %v1258_v56 = vadd.s32 1, %v3407_v43 }
 0x137   :  { %v1167_v49 = vsel %vm2151_vm12, 0, %v2150_v7  ;;  %vm1315_vm13 = vcmp.gt.s32.totalorder %v1314_v15, 0  ;;  %vm1087_vm14 = vcmp.lt.s32.totalorder %v1086_v38, 2  ;;  %vm1088_vm15 = vcmp.eq.s32.totalorder %v1086_v38, 0 }
 0x138   :  { %v1168_v0 = vsub.s32 32, %v1167_v49  ;;  %v1169_v2 = vshll.u32 %v3391_v52, %v1167_v49  ;;  %v1172_v51 = vsub.s32 4294967266, %v1167_v49  ;;  %vm1257_vm0 = vc.u32 %v3421_v41, %v3406_v24 }
 0x139   :  { %v1316_v23 = vsel %vm1315_vm13, %v1314_v15, 0  ;;  %vm1091_vm1 = vcmp.eq.s32.totalorder %v1086_v38, 2  ;;  %v1259_v57 = vsel %vm1257_vm0, %v1258_v56, %v3407_v43  ;;  %v3434_v27 = vadd.s32 3, %v1185_v20 }
 0x13a   :  { %v2303_v59 = vpop.eup %2302  ;;  %v1170_v42 = vshrl.u32 %v1152_v18, %v1168_v0  ;;  %v1173_v29 = vadd.s32 127, %v1172_v51  ;;  %v1260_v40 = vadd.s32 %v1259_v57, %v1255_v9  ;;  %v1318_v62 = vand.u32 31, %v1316_v23 }
 0x13b   :  { %v2305_v13 = vpop.eup %2304  ;;  %v1092_v4 = vxor.u32 2147483648, %v2303_v59  ;;  %v1312_v17 = vor.u32 8388608, %v1311_v46  ;;  %v1408_v5 = vand.u32 2147483647, %v3436_v63  ;;  %v1411_v22 = vand.u32 2139095040, %v3436_v63 }
 0x13c   :  { %v1089_v52 = vxor.u32 2147483648, %v2305_v13  ;;  %v1171_v54 = vor.u32 %v1170_v42, %v1169_v2  ;;  %v1174_v61 = vshll.u32 %v1173_v29, 23  ;;  %v1261_v11 = vadd.s32 536870912, %v1260_v40 }
 0x13d   :  { %v1093_v58 = vsel %vm1091_vm1, %v1092_v4, %v2305_v13  ;;  %v1319_v12 = vsub.s32 32, %v1318_v62  ;;  %v1321_v34 = vshll.u32 %v2410_v31, %v1318_v62  ;;  %v1324_v36 = vshll.u32 %v2411_v33, %v1318_v62 }
 0x13e   :  { %v1090_v28 = vsel %vm1088_vm15, %v2303_v59, %v1089_v52  ;;  %v1175_v14 = vor.u32 4788187, %v1174_v61  ;;  %v1178_v1 = vcvt.s32.f32 %v1171_v54  ;;  %v3442_v21 = vshrl.u32 %v1261_v11, 30 }
 0x13f   :  { %v1094_v8 = vsel %vm1087_vm14, %v1090_v28, %v1093_v58  ;;  %v1322_v53 = vshrl.u32 %v2411_v33, %v1319_v12  ;;  %v1325_v44 = vshrl.u32 %v2412_v35, %v1319_v12  ;;  %v1317_v16 = vshrl.u32 %v1316_v23, 5 }
 0x140   :  { %v1095_v45 = vsel %vm1084_vm10, nan, %v1094_v8  ;;  %v1176_v3 = vand.u32 2147483647, %v1175_v14  ;;  %v1263_v7 = vshll.u32 %v3442_v21, 30  ;;  %v3452_v60 = vshll.u32 %v1312_v17, 8 }
 0x141   :  { %v1985_v43 = vrot.slane %v1095_v45, %v2617_v25  ;;  %v1327_v38 = vshll.u32 %v2412_v35, %v1318_v62  ;;  %v1328_v6 = vshrl.u32 %v2413_v37, %v1319_v12  ;;  %v1330_v50 = vshll.u32 %v2413_v37, %v1318_v62 }
 0x142   :  { %v1179_v48 = vmul.f32 %v1178_v1, %v1176_v3  ;;  %v3457_v18 = vsub.s32 %v1260_v40, %v1263_v7  ;;  %v1331_v46 = vshrl.u32 %v2414_v39, %v1319_v12  ;;  %v1333_v15 = vshll.u32 %v2414_v39, %v1318_v62 }
 0x143   :  { %2044 = vst [vmem:[#allocation7 + $0x120] sm:$0xff] %v1985_v43  ;;  %2045 = vst [vmem:[#allocation7 + $0x130] sm:$0xff] %v1985_v43  ;;  %v1412_v49 = vshrl.u32 %v1411_v22, 23  ;;  %v1323_v9 = vor.u32 %v1322_v53, %v1321_v34  ;;  %v1326_v56 = vor.u32 %v1325_v44, %v1324_v36  ;;  %v1334_v0 = vshrl.u32 %v2415_v47, %v1319_v12 }
 0x144   :  { %v1180_v20 = vxor.u32 2147483648, %v1179_v48  ;;  %v1266_v2 = vsub.s32 0, %v3457_v18  ;;  %v1320_v51 = vshrl.u32 %v2410_v31, %v1319_v12  ;;  %v1332_v23 = vor.u32 %v1331_v46, %v1330_v50 }
 0x145   :  { %vm1336_vm2 = vcmp.lt.s32.totalorder %v1317_v16, 1  ;;  %v1329_v42 = vor.u32 %v1328_v6, %v1327_v38  ;;  %vm1337_vm3 = vcmp.lt.s32.totalorder %v1317_v16, 2  ;;  %vm1339_vm4 = vcmp.lt.s32.totalorder %v1317_v16, 4 }
 0x146   :  { %v1181_v59 = vsel %vm1098_vm9, %v1180_v20, %v1179_v48  ;;  %v2153_v57 = vmin.u32 %v1266_v2, %v3457_v18  ;;  %v1335_v13 = vor.u32 %v1334_v0, %v1333_v15  ;;  %vm1338_vm5 = vcmp.lt.s32.totalorder %v1317_v16, 3 }
 0x147   :  { %v1184_v29 = vsel %vm3416_vm11, %v3179_v10, %v1181_v59  ;;  %v1341_v4 = vsel %vm1339_vm4, %v1329_v42, 2102212464  ;;  %v1344_v40 = vsel %vm1336_vm2, %v1323_v9, %v1326_v56  ;;  %v1345_v62 = vsel %vm1339_vm4, %v1332_v23, 920167782 }
 0x148   :  { %2306 = vcosq.f32 %v1184_v29  ;;  %v1268_v52 = vclz %v2153_v57  ;;  %v1340_v54 = vsel %vm1336_vm2, %v1320_v51, %v1323_v9  ;;  %v2160_v61 = vadd.s32 4294967169, %v1412_v49 }
 0x149   :  { %2308 = vsinq.f32 %v1184_v29  ;;  %v1256_v55 = vadd.s32 %v3406_v24, %v3421_v41  ;;  %v1342_v17 = vsel %vm1338_vm5, %v1326_v56, %v1341_v4  ;;  %v1346_v58 = vsel %vm1338_vm5, %v1329_v42, %v1345_v62 }
 0x14a   :  { %v1348_v11 = vsel %vm1336_vm2, %v1326_v56, %v1329_v42  ;;  %v2154_v12 = vadd.s32 4294967294, %v1268_v52  ;;  %v1286_v28 = vsub.s32 4, %v3442_v21  ;;  %v1347_v14 = vsel %vm1337_vm3, %v1344_v40, %v1346_v58 }
 0x14b   :  { %v1349_v1 = vsel %vm1339_vm4, %v1335_v13, 1326507024  ;;  %v1343_v22 = vsel %vm1337_vm3, %v1340_v54, %v1342_v17  ;;  %v3485_v34 = vmul.u32.u64.low %v3452_v60, %v1347_v14  ;;  %v3486_v24 = vmul.u32.u64.high %v3452_v60, %v1347_v14, %v3485_v34 }
 0x14c   :  { %v1350_v8 = vsel %vm1338_vm5, %v1332_v23, %v1349_v1  ;;  %vm2155_vm6 = vcmp.lt.s32.totalorder %v2154_v12, 0  ;;  %v1415_v36 = vand.u32 8388607, %v1408_v5  ;;  %v1418_v45 = vadd.s32 1, %v2160_v61 }
 0x14d   :  { %v1351_v41 = vsel %vm1337_vm3, %v1348_v11, %v1350_v8  ;;  %v1190_v3 = vand.u32 3, %v3434_v27  ;;  %v1271_v53 = vsel %vm2155_vm6, 0, %v2154_v12  ;;  %vm1202_vm7 = vcmp.lt.s32.totalorder %v3274_v19, 0 }
 0x14e   :  { %v3494_v44 = vmul.u32.u64.low %v3452_v60, %v1351_v41  ;;  %v3495_v43 = vmul.u32.u64.high %v3452_v60, %v1351_v41, %v3494_v44  ;;  %v1272_v7 = vsub.s32 32, %v1271_v53  ;;  %v1273_v48 = vshll.u32 %v3457_v18, %v1271_v53 }
 0x14f   :  { %v1276_v38 = vsub.s32 4294967266, %v1271_v53  ;;  %vm1188_vm8 = vweird.f32 %v3179_v10  ;;  %v3503_v16 = vsel %vm1202_vm7, %v1286_v28, %v3442_v21  ;;  %v1359_v27 = vmul.u32 %v3452_v60, %v1343_v22 }
 0x150   :  { %v1362_v6 = vadd.s32 1, %v3486_v24  ;;  %vm1419_vm9 = vcmp.gt.s32.totalorder %v1418_v45, 0  ;;  %v1274_v50 = vshrl.u32 %v1256_v55, %v1272_v7  ;;  %v1416_v15 = vor.u32 8388608, %v1415_v36 }
 0x151   :  { %v1277_v46 = vadd.s32 127, %v1276_v38  ;;  %v1420_v49 = vsel %vm1419_vm9, %v1418_v45, 0  ;;  %vm1191_vm10 = vcmp.lt.s32.totalorder %v1190_v3, 2  ;;  %vm3509_vm11 = vcmp.le.f32.partialorder %v1200_v32, 0.7853982 }
 0x152   :  { %vm1361_vm12 = vc.u32 %v3495_v43, %v3485_v34  ;;  %v1422_v21 = vand.u32 31, %v1420_v49  ;;  %vm1192_vm13 = vcmp.eq.s32.totalorder %v1190_v3, 0  ;;  %v1275_v60 = vor.u32 %v1274_v50, %v1273_v48 }
 0x153   :  { %v1278_v20 = vshll.u32 %v1277_v46, 23  ;;  %v1363_v9 = vsel %vm1361_vm12, %v1362_v6, %v3486_v24  ;;  %vm1195_vm14 = vcmp.eq.s32.totalorder %v1190_v3, 2  ;;  %v1289_v56 = vsel %vm3509_vm11, 0, %v3503_v16 }
 0x154   :  { %v1364_v0 = vadd.s32 %v1363_v9, %v1359_v27  ;;  %v1423_v2 = vsub.s32 32, %v1422_v21  ;;  %v1282_v23 = vcvt.s32.f32 %v1275_v60  ;;  %v3519_v59 = vshrl.u32 %v1420_v49, 5  ;;  %v3557_v60 = vld [vmem:[#allocation2 + $0xe] sm:$0x1] }
 0x155   :  { %v2307_v32 = vpop.eup %2306  ;;  %v1279_v51 = vor.u32 4788187, %v1278_v20  ;;  %v3521_v42 = vshll.u32 %v1416_v15, 8  ;;  %v1425_v4 = vshll.u32 %v2410_v31, %v1422_v21  ;;  %v1428_v54 = vshll.u32 %v2411_v33, %v1422_v21 }
 0x156   :  { %v2309_v29 = vpop.eup %2308  ;;  %v1196_v57 = vxor.u32 2147483648, %v2307_v32  ;;  %v1365_v13 = vadd.s32 536870912, %v1364_v0  ;;  %v1426_v40 = vshrl.u32 %v2411_v33, %v1423_v2  ;;  %v1431_v61 = vshll.u32 %v2412_v35, %v1422_v21 }
 0x157   :  { %v1193_v62 = vxor.u32 2147483648, %v2309_v29  ;;  %v1280_v52 = vand.u32 2147483647, %v1279_v51  ;;  %v1429_v58 = vshrl.u32 %v2412_v35, %v1423_v2  ;;  %v1432_v11 = vshrl.u32 %v2413_v37, %v1423_v2 }
 0x158   :  { %v1197_v55 = vsel %vm1195_vm14, %v1196_v57, %v2309_v29  ;;  %v1366_v17 = vshrl.u32 %v1365_v13, 30  ;;  %v1434_v14 = vshll.u32 %v2413_v37, %v1422_v21  ;;  %v1435_v1 = vshrl.u32 %v2414_v39, %v1423_v2 }
 0x159   :  { %v1194_v12 = vsel %vm1192_vm13, %v2307_v32, %v1193_v62  ;;  %v1283_v28 = vmul.f32 %v1282_v23, %v1280_v52  ;;  %v1424_v24 = vshrl.u32 %v2410_v31, %v1423_v2  ;;  %v1427_v41 = vor.u32 %v1426_v40, %v1425_v4 }
 0x15a   :  { %v1198_v22 = vsel %vm1191_vm10, %v1194_v12, %v1197_v55  ;;  %v1367_v8 = vshll.u32 %v1366_v17, 30  ;;  %v1437_v53 = vshll.u32 %v2414_v39, %v1422_v21  ;;  %v1438_v44 = vshrl.u32 %v2415_v47, %v1423_v2 }
 0x15b   :  { %v1199_v36 = vsel %vm1188_vm8, nan, %v1198_v22  ;;  %v1284_v45 = vxor.u32 2147483648, %v1283_v28  ;;  %v1430_v38 = vor.u32 %v1429_v58, %v1428_v54  ;;  %v1433_v16 = vor.u32 %v1432_v11, %v1431_v61 }
 0x15c   :  { %v1989_v7 = vrot.slane %v1199_v36, %v2617_v25  ;;  %v3540_v48 = vsub.s32 %v1364_v0, %v1367_v8  ;;  %v1436_v27 = vor.u32 %v1435_v1, %v1434_v14  ;;  %v1439_v6 = vor.u32 %v1438_v44, %v1437_v53  ;;  %v3599_v36 = vld [vmem:[#allocation2 + $0xf] sm:$0x1] }
 0x15d   :  { %v1285_v3 = vsel %vm1202_vm7, %v1284_v45, %v1283_v28  ;;  %vm1440_vm15 = vcmp.lt.s32.totalorder %v3519_v59, 1  ;;  %v1390_v46 = vsub.s32 4, %v1366_v17  ;;  %vm1441_vm0 = vcmp.lt.s32.totalorder %v3519_v59, 2 }
 0x15e   :  { %2046 = vst [vmem:[#allocation7 + $0x140] sm:$0xff] %v1989_v7  ;;  %2047 = vst [vmem:[#allocation7 + $0x150] sm:$0xff] %v1989_v7  ;;  %v1288_v10 = vsel %vm3509_vm11, %v3274_v19, %v1285_v3  ;;  %v1370_v50 = vsub.s32 0, %v3540_v48  ;;  %vm1442_vm1 = vcmp.lt.s32.totalorder %v3519_v59, 3  ;;  %vm1443_vm2 = vcmp.lt.s32.totalorder %v3519_v59, 4 }
 0x15f   :  { %2310 = vcosq.f32 %v1288_v10  ;;  %v1444_v15 = vsel %vm1440_vm15, %v1424_v24, %v1427_v41  ;;  %v1445_v21 = vsel %vm1443_vm2, %v1433_v16, 2102212464  ;;  %v1448_v18 = vsel %vm1440_vm15, %v1427_v41, %v1430_v38 }
 0x160   :  { %2312 = vsinq.f32 %v1288_v10  ;;  %v2157_v49 = vmin.u32 %v1370_v50, %v3540_v48  ;;  %v1446_v20 = vsel %vm1442_vm1, %v1430_v38, %v1445_v21  ;;  %v1449_v9 = vsel %vm1443_vm2, %v1436_v27, 920167782 }
 0x161   :  { %v1452_v0 = vsel %vm1440_vm15, %v1430_v38, %v1433_v16  ;;  %v1453_v2 = vsel %vm1443_vm2, %v1439_v6, 1326507024  ;;  %v1293_v32 = vadd.s32 3, %v1289_v56  ;;  %vm3565_vm3 = vcmp.le.f32.partialorder %v1304_v30, 0.7853982 }
 0x162   :  { %vm1306_vm4 = vcmp.lt.s32.totalorder %v3371_v26, 0  ;;  %v1372_v23 = vclz %v2157_v49  ;;  %v1450_v57 = vsel %vm1442_vm1, %v1433_v16, %v1449_v9  ;;  %v1454_v13 = vsel %vm1442_vm1, %v1436_v27, %v1453_v2 }
 0x163   :  { %v1391_v29 = vsel %vm1306_vm4, %v1390_v46, %v1366_v17  ;;  %v1515_v56 = vand.u32 2139095040, %v3557_v60  ;;  %v1447_v30 = vsel %vm1441_vm0, %v1444_v15, %v1446_v20  ;;  %v1451_v40 = vsel %vm1441_vm0, %v1448_v18, %v1450_v57 }
 0x164   :  { %v2158_v4 = vadd.s32 4294967294, %v1372_v23  ;;  %v1455_v62 = vsel %vm1441_vm0, %v1452_v0, %v1454_v13  ;;  %v3588_v61 = vmul.u32.u64.low %v3521_v42, %v1451_v40  ;;  %v3589_v55 = vmul.u32.u64.high %v3521_v42, %v1451_v40, %v3588_v61 }
 0x165   :  { %v3584_v52 = vmul.u32.u64.low %v3521_v42, %v1455_v62  ;;  %v3585_v54 = vmul.u32.u64.high %v3521_v42, %v1455_v62, %v3584_v52  ;;  %v1294_v17 = vand.u32 3, %v1293_v32  ;;  %v1360_v58 = vadd.s32 %v3485_v34, %v3495_v43 }
 0x166   :  { %vm2159_vm5 = vcmp.lt.s32.totalorder %v2158_v4, 0  ;;  %v1516_v11 = vshrl.u32 %v1515_v56, 23  ;;  %v1393_v28 = vsel %vm3565_vm3, 0, %v1391_v29  ;;  %v1463_v59 = vmul.u32 %v3521_v42, %v1447_v30 }
 0x167   :  { %v1375_v12 = vsel %vm2159_vm5, 0, %v2158_v4  ;;  %vm1465_vm6 = vc.u32 %v3585_v54, %v3588_v61  ;;  %v1466_v24 = vadd.s32 1, %v3589_v55  ;;  %vm1295_vm7 = vcmp.lt.s32.totalorder %v1294_v17, 2 }
 0x168   :  { %v1376_v14 = vsub.s32 32, %v1375_v12  ;;  %v1377_v1 = vshll.u32 %v3540_v48, %v1375_v12  ;;  %v1380_v22 = vsub.s32 4294967266, %v1375_v12  ;;  %v2164_v8 = vadd.s32 4294967169, %v1516_v11 }
 0x169   :  { %vm1299_vm8 = vcmp.eq.s32.totalorder %v1294_v17, 2  ;;  %v1397_v45 = vadd.s32 3, %v1393_v28  ;;  %v1467_v53 = vsel %vm1465_vm6, %v1466_v24, %v3589_v55  ;;  %v1512_v42 = vand.u32 2147483647, %v3557_v60 }
 0x16a   :  { %v1378_v41 = vshrl.u32 %v1360_v58, %v1376_v14  ;;  %v1381_v34 = vadd.s32 127, %v1380_v22  ;;  %v1522_v43 = vadd.s32 1, %v2164_v8  ;;  %v1468_v38 = vadd.s32 %v1467_v53, %v1463_v59 }
 0x16b   :  { %vm1296_vm10 = vcmp.eq.s32.totalorder %v1294_v17, 0  ;;  %v1619_v6 = vand.u32 2139095040, %v3599_v36  ;;  %vm1292_vm11 = vweird.f32 %v3274_v19  ;;  %v1519_v21 = vand.u32 8388607, %v1512_v42 }
 0x16c   :  { %v2311_v44 = vpop.eup %2310  ;;  %v1379_v7 = vor.u32 %v1378_v41, %v1377_v1  ;;  %v1382_v48 = vshll.u32 %v1381_v34, 23  ;;  %vm1523_vm9 = vcmp.gt.s32.totalorder %v1522_v43, 0  ;;  %v1469_v15 = vadd.s32 536870912, %v1468_v38 }
 0x16d   :  { %v2313_v16 = vpop.eup %2312  ;;  %v1300_v3 = vxor.u32 2147483648, %v2311_v44  ;;  %v1524_v27 = vsel %vm1523_vm9, %v1522_v43, 0  ;;  %v3608_v0 = vand.u32 3, %v1397_v45  ;;  %v1616_v29 = vand.u32 2147483647, %v3599_v36 }
 0x16e   :  { %v1297_v10 = vxor.u32 2147483648, %v2313_v16  ;;  %v1383_v50 = vor.u32 4788187, %v1382_v48  ;;  %v1386_v46 = vcvt.s32.f32 %v1379_v7  ;;  %v1526_v18 = vand.u32 31, %v1524_v27 }
 0x16f   :  { %v1301_v49 = vsel %vm1299_vm8, %v1300_v3, %v2313_v16  ;;  %v3610_v2 = vshrl.u32 %v1469_v15, 30  ;;  %v1620_v57 = vshrl.u32 %v1619_v6, 23  ;;  %v3615_v56 = vadd.s32 %v3588_v61, %v3585_v54 }
 0x170   :  { %v1298_v20 = vsel %vm1296_vm10, %v2311_v44, %v1297_v10  ;;  %v1384_v9 = vand.u32 2147483647, %v1383_v50  ;;  %v1527_v23 = vsub.s32 32, %v1526_v18  ;;  %v1520_v40 = vor.u32 8388608, %v1519_v21 }
 0x171   :  { %v1302_v32 = vsel %vm1295_vm7, %v1298_v20, %v1301_v49  ;;  %v1471_v4 = vshll.u32 %v3610_v2, 30  ;;  %v1529_v62 = vshll.u32 %v2410_v31, %v1526_v18  ;;  %v1532_v58 = vshll.u32 %v2411_v33, %v1526_v18 }
 0x172   :  { %v1303_v13 = vsel %vm1292_vm11, nan, %v1302_v32  ;;  %v1387_v19 = vmul.f32 %v1386_v46, %v1384_v9  ;;  %v1530_v52 = vshrl.u32 %v2411_v33, %v1527_v23  ;;  %v1533_v11 = vshrl.u32 %v2412_v35, %v1527_v23 }
 0x173   :  { %v1993_v30 = vrot.slane %v1303_v13, %v2617_v25  ;;  %v3621_v17 = vsub.s32 %v1468_v38, %v1471_v4  ;;  %v1525_v54 = vshrl.u32 %v1524_v27, 5  ;;  %v1535_v61 = vshll.u32 %v2412_v35, %v1526_v18 }
 0x174   :  { %v1388_v55 = vxor.u32 2147483648, %v1387_v19  ;;  %v1536_v12 = vshrl.u32 %v2413_v37, %v1527_v23  ;;  %v2168_v28 = vadd.s32 4294967169, %v1620_v57  ;;  %v1528_v1 = vshrl.u32 %v2410_v31, %v1527_v23 }
 0x175   :  { %2048 = vst [vmem:[#allocation7 + $0x160] sm:$0xff] %v1993_v30  ;;  %2049 = vst [vmem:[#allocation7 + $0x170] sm:$0xff] %v1993_v30  ;;  %v1474_v14 = vsub.s32 0, %v3621_v17  ;;  %v1538_v22 = vshll.u32 %v2413_v37, %v1526_v18  ;;  %v1531_v24 = vor.u32 %v1530_v52, %v1529_v62  ;;  %v1539_v41 = vshrl.u32 %v2414_v39, %v1527_v23 }
 0x176   :  { %v1389_v59 = vsel %vm1306_vm4, %v1388_v55, %v1387_v19  ;;  %v1541_v34 = vshll.u32 %v2414_v39, %v1526_v18  ;;  %v1534_v45 = vor.u32 %v1533_v11, %v1532_v58  ;;  %v1542_v53 = vshrl.u32 %v2415_v47, %v1527_v23 }
 0x177   :  { %v1392_v8 = vsel %vm3565_vm3, %v3371_v26, %v1389_v59  ;;  %v2161_v43 = vmin.u32 %v1474_v14, %v3621_v17  ;;  %v1537_v44 = vor.u32 %v1536_v12, %v1535_v61  ;;  %v1540_v7 = vor.u32 %v1539_v41, %v1538_v22 }
 0x178   :  { %2314 = vcosq.f32 %v1392_v8  ;;  %vm1544_vm12 = vcmp.lt.s32.totalorder %v1525_v54, 1  ;;  %vm1545_vm13 = vcmp.lt.s32.totalorder %v1525_v54, 2  ;;  %v1560_v38 = vshll.u32 %v1520_v40, 8 }
 0x179   :  { %2316 = vsinq.f32 %v1392_v8  ;;  %v1476_v48 = vclz %v2161_v43  ;;  %v1626_v51 = vadd.s32 1, %v2168_v28  ;;  %vm1410_vm14 = vcmp.lt.s32.totalorder %v3436_v63, 0 }
 0x17a   :  { %v1543_v16 = vor.u32 %v1542_v53, %v1541_v34  ;;  %vm1546_vm15 = vcmp.lt.s32.totalorder %v1525_v54, 3  ;;  %vm1547_vm0 = vcmp.lt.s32.totalorder %v1525_v54, 4  ;;  %v1548_v3 = vsel %vm1544_vm12, %v1528_v1, %v1531_v24 }
 0x17b   :  { %v2162_v27 = vadd.s32 4294967294, %v1476_v48  ;;  %v1549_v6 = vsel %vm1547_vm0, %v1537_v44, 2102212464  ;;  %v1552_v10 = vsel %vm1544_vm12, %v1531_v24, %v1534_v45  ;;  %v1553_v50 = vsel %vm1547_vm0, %v1540_v7, 920167782 }
 0x17c   :  { %v1550_v46 = vsel %vm1546_vm15, %v1534_v45, %v1549_v6  ;;  %v1554_v15 = vsel %vm1546_vm15, %v1537_v44, %v1553_v50  ;;  %v1556_v49 = vsel %vm1544_vm12, %v1534_v45, %v1537_v44  ;;  %v1557_v21 = vsel %vm1547_vm0, %v1543_v16, 1326507024 }
 0x17d   :  { %vm2163_vm1 = vcmp.lt.s32.totalorder %v2162_v27, 0  ;;  %v1494_v18 = vsub.s32 4, %v3610_v2  ;;  %v1555_v20 = vsel %vm1545_vm13, %v1552_v10, %v1554_v15  ;;  %v1558_v9 = vsel %vm1546_vm15, %v1540_v7, %v1557_v21 }
 0x17e   :  { %v1479_v32 = vsel %vm2163_vm1, 0, %v2162_v27  ;;  %v1559_v23 = vsel %vm1545_vm13, %v1556_v49, %v1558_v9  ;;  %v3646_v57 = vmul.u32.u64.low %v1560_v38, %v1555_v20  ;;  %v3647_v13 = vmul.u32.u64.high %v1560_v38, %v1555_v20, %v3646_v57  ;;  %v3692_v49 = vld [vmem:[#allocation5] sm:$0xff] }
 0x17f   :  { %vm1396_vm2 = vweird.f32 %v3371_v26  ;;  %v1480_v19 = vsub.s32 32, %v1479_v32  ;;  %v1481_v4 = vshll.u32 %v3621_v17, %v1479_v32  ;;  %v1484_v30 = vsub.s32 4294967266, %v1479_v32 }
 0x180   :  { %v1551_v40 = vsel %vm1545_vm13, %v1548_v3, %v1550_v46  ;;  %v3653_v62 = vmul.u32.u64.low %v1560_v38, %v1559_v23  ;;  %v3654_v52 = vmul.u32.u64.high %v1560_v38, %v1559_v23, %v3653_v62  ;;  %v3658_v55 = vand.u32 8388607, %v1616_v29 }
 0x181   :  { %vm1627_vm3 = vcmp.gt.s32.totalorder %v1626_v51, 0  ;;  %vm3662_vm4 = vcmp.le.f32.partialorder %v1408_v5, 0.7853982  ;;  %v1482_v11 = vshrl.u32 %v3615_v56, %v1480_v19  ;;  %v1485_v17 = vadd.s32 127, %v1484_v30 }
 0x182   :  { %v1628_v61 = vsel %vm1627_vm3, %v1626_v51, 0  ;;  %vm1399_vm5 = vcmp.lt.s32.totalorder %v3608_v0, 2  ;;  %v1567_v54 = vmul.u32 %v1560_v38, %v1551_v40  ;;  %v1570_v12 = vadd.s32 1, %v3647_v13 }
 0x183   :  { %v1630_v28 = vand.u32 31, %v1628_v61  ;;  %vm1400_vm6 = vcmp.eq.s32.totalorder %v3608_v0, 0  ;;  %v1483_v59 = vor.u32 %v1482_v11, %v1481_v4  ;;  %v1486_v14 = vshll.u32 %v1485_v17, 23 }
 0x184   :  { %v1495_v5 = vsel %vm1410_vm14, %v1494_v18, %v3610_v2  ;;  %vm1403_vm7 = vcmp.eq.s32.totalorder %v3608_v0, 2  ;;  %vm1569_vm8 = vc.u32 %v3654_v52, %v3646_v57  ;;  %v1624_v56 = vor.u32 8388608, %v3658_v55 }
 0x185   :  { %v2315_v1 = vpop.eup %2314  ;;  %v1631_v22 = vsub.s32 32, %v1630_v28  ;;  %v1487_v41 = vor.u32 4788187, %v1486_v14  ;;  %v1490_v34 = vcvt.s32.f32 %v1483_v59  ;;  %v1571_v43 = vsel %vm1569_vm8, %v1570_v12, %v3647_v13 }
 0x186   :  { %v2317_v8 = vpop.eup %2316  ;;  %v1404_v24 = vxor.u32 2147483648, %v2315_v1  ;;  %v1497_v53 = vsel %vm3662_vm4, 0, %v1495_v5  ;;  %v1572_v2 = vadd.s32 %v1571_v43, %v1567_v54  ;;  %v3680_v44 = vshrl.u32 %v1628_v61, 5 }
 0x187   :  { %v1401_v45 = vxor.u32 2147483648, %v2317_v8  ;;  %v1488_v48 = vand.u32 2147483647, %v1487_v41  ;;  %v1633_v38 = vshll.u32 %v2410_v31, %v1630_v28  ;;  %v1634_v51 = vshrl.u32 %v2411_v33, %v1631_v22 }
 0x188   :  { %v1405_v7 = vsel %vm1403_vm7, %v1404_v24, %v2317_v8  ;;  %v1573_v3 = vadd.s32 536870912, %v1572_v2  ;;  %v1636_v27 = vshll.u32 %v2411_v33, %v1630_v28  ;;  %v1637_v6 = vshrl.u32 %v2412_v35, %v1631_v22 }
 0x189   :  { %v1402_v16 = vsel %vm1400_vm6, %v2315_v1, %v1401_v45  ;;  %v1491_v50 = vmul.f32 %v1490_v34, %v1488_v48  ;;  %v1639_v46 = vshll.u32 %v2412_v35, %v1630_v28  ;;  %v1640_v15 = vshrl.u32 %v2413_v37, %v1631_v22 }
 0x18a   :  { %v1406_v10 = vsel %vm1399_vm5, %v1402_v16, %v1405_v7  ;;  %v3696_v18 = vshrl.u32 %v1573_v3, 30  ;;  %v1642_v20 = vshll.u32 %v2413_v37, %v1630_v28  ;;  %v1643_v9 = vshrl.u32 %v2414_v39, %v1631_v22 }
 0x18b   :  { %v1407_v21 = vsel %vm1396_vm2, nan, %v1406_v10  ;;  %v1492_v0 = vxor.u32 2147483648, %v1491_v50  ;;  %v1501_v23 = vadd.s32 3, %v1497_v53  ;;  %v1645_v13 = vshll.u32 %v2414_v39, %v1630_v28 }
 0x18c   :  { %v1997_v32 = vrot.slane %v1407_v21, %v2617_v25  ;;  %v1575_v19 = vshll.u32 %v3696_v18, 30  ;;  %v1632_v4 = vshrl.u32 %v2410_v31, %v1631_v22  ;;  %v1646_v30 = vshrl.u32 %v2415_v47, %v1631_v22 }
 0x18d   :  { %v1725_v26 = vand.u32 2139095040, %v3692_v49  ;;  %v1493_v40 = vsel %vm1410_vm14, %v1492_v0, %v1491_v50  ;;  %v1635_v62 = vor.u32 %v1634_v51, %v1633_v38  ;;  %v1638_v55 = vor.u32 %v1637_v6, %v1636_v27 }
 0x18e   :  { %2050 = vst [vmem:[#allocation7 + $0x180] sm:$0xff] %v1997_v32  ;;  %2051 = vst [vmem:[#allocation7 + $0x190] sm:$0xff] %v1997_v32  ;;  %v1644_v11 = vor.u32 %v1643_v9, %v1642_v20  ;;  %v1496_v17 = vsel %vm3662_vm4, %v3436_v63, %v1493_v40  ;;  %v3711_v61 = vsub.s32 %v1572_v2, %v1575_v19  ;;  %vm1648_vm9 = vcmp.lt.s32.totalorder %v3680_v44, 1 }
 0x18f   :  { %v1641_v54 = vor.u32 %v1640_v15, %v1639_v46  ;;  %2318 = vcosq.f32 %v1496_v17  ;;  %v1647_v12 = vor.u32 %v1646_v30, %v1645_v13  ;;  %vm1650_vm10 = vcmp.lt.s32.totalorder %v3680_v44, 3 }
 0x190   :  { %vm1651_vm11 = vcmp.lt.s32.totalorder %v3680_v44, 4  ;;  %2320 = vsinq.f32 %v1496_v17  ;;  %v1578_v28 = vsub.s32 0, %v3711_v61  ;;  %vm1649_vm12 = vcmp.lt.s32.totalorder %v3680_v44, 2 }
 0x191   :  { %v1653_v59 = vsel %vm1651_vm11, %v1641_v54, 2102212464  ;;  %v1656_v58 = vsel %vm1648_vm9, %v1635_v62, %v1638_v55  ;;  %v1657_v14 = vsel %vm1651_vm11, %v1644_v11, 920167782  ;;  %v1664_v5 = vshll.u32 %v1624_v56, 8 }
 0x192   :  { %v2165_v1 = vmin.u32 %v1578_v28, %v3711_v61  ;;  %v1652_v22 = vsel %vm1648_vm9, %v1632_v4, %v1635_v62  ;;  %v1654_v8 = vsel %vm1650_vm10, %v1638_v55, %v1653_v59  ;;  %v1658_v24 = vsel %vm1650_vm10, %v1641_v54, %v1657_v14 }
 0x193   :  { %v1659_v41 = vsel %vm1649_vm12, %v1656_v58, %v1658_v24  ;;  %v1660_v34 = vsel %vm1648_vm9, %v1638_v55, %v1641_v54  ;;  %v1661_v43 = vsel %vm1651_vm11, %v1647_v12, 1326507024  ;;  %v1726_v45 = vshrl.u32 %v1725_v26, 23 }
 0x194   :  { %v1502_v56 = vand.u32 3, %v1501_v23  ;;  %vm1514_vm13 = vcmp.lt.s32.totalorder %v3557_v60, 0  ;;  %v1580_v53 = vclz %v2165_v1  ;;  %v1662_v2 = vsel %vm1650_vm10, %v1644_v11, %v1661_v43  ;;  %v3777_v43 = vld [vmem:[#allocation5 + $0x8] sm:$0xff] }
 0x195   :  { %v3734_v7 = vmul.u32.u64.low %v1664_v5, %v1659_v41  ;;  %v3735_v48 = vmul.u32.u64.high %v1664_v5, %v1659_v41, %v3734_v7  ;;  %v2172_v38 = vadd.s32 4294967169, %v1726_v45  ;;  %v1655_v16 = vsel %vm1649_vm12, %v1652_v22, %v1654_v8 }
 0x196   :  { %v2166_v51 = vadd.s32 4294967294, %v1580_v53  ;;  %v1663_v3 = vsel %vm1649_vm12, %v1660_v34, %v1662_v2  ;;  %v1722_v27 = vand.u32 2147483647, %v3692_v49  ;;  %vm1500_vm14 = vweird.f32 %v3436_v63 }
 0x197   :  { %v1598_v6 = vsub.s32 4, %v3696_v18  ;;  %v3745_v10 = vmul.u32.u64.low %v1664_v5, %v1663_v3  ;;  %v3746_v50 = vmul.u32.u64.high %v1664_v5, %v1663_v3, %v3745_v10  ;;  %v1732_v46 = vadd.s32 1, %v2172_v38 }
 0x198   :  { %vm1503_vm15 = vcmp.lt.s32.totalorder %v1502_v56, 2  ;;  %vm3750_vm0 = vcmp.le.f32.partialorder %v1512_v42, 0.7853982  ;;  %v1568_v44 = vadd.s32 %v3646_v57, %v3654_v52  ;;  %vm2167_vm1 = vcmp.lt.s32.totalorder %v2166_v51, 0 }
 0x199   :  { %v1583_v21 = vsel %vm2167_vm1, 0, %v2166_v51  ;;  %v1671_v20 = vmul.u32 %v1664_v5, %v1655_v16  ;;  %v1674_v9 = vadd.s32 1, %v3735_v48  ;;  %vm1733_vm2 = vcmp.gt.s32.totalorder %v1732_v46, 0 }
 0x19a   :  { %v1584_v32 = vsub.s32 32, %v1583_v21  ;;  %v1585_v0 = vshll.u32 %v3711_v61, %v1583_v21  ;;  %v1588_v23 = vsub.s32 4294967266, %v1583_v21  ;;  %v1734_v13 = vsel %vm1733_vm2, %v1732_v46, 0 }
 0x19b   :  { %v3761_v42 = vsel %vm1514_vm13, %v1598_v6, %v3696_v18  ;;  %vm1673_vm3 = vc.u32 %v3746_v50, %v3734_v7  ;;  %v1729_v57 = vand.u32 8388607, %v1722_v27  ;;  %v1736_v52 = vand.u32 31, %v1734_v13 }
 0x19c   :  { %v2319_v19 = vpop.eup %2318  ;;  %vm1507_vm4 = vcmp.eq.s32.totalorder %v1502_v56, 2  ;;  %v1586_v4 = vshrl.u32 %v1568_v44, %v1584_v32  ;;  %v1589_v30 = vadd.s32 127, %v1588_v23  ;;  %v1675_v26 = vsel %vm1673_vm3, %v1674_v9, %v3735_v48 }
 0x19d   :  { %v2321_v40 = vpop.eup %2320  ;;  %vm1504_vm5 = vcmp.eq.s32.totalorder %v1502_v56, 0  ;;  %v1508_v62 = vxor.u32 2147483648, %v2319_v19  ;;  %v1676_v55 = vadd.s32 %v1675_v26, %v1671_v20  ;;  %v1737_v11 = vsub.s32 32, %v1736_v52 }
 0x19e   :  { %v1505_v18 = vxor.u32 2147483648, %v2321_v40  ;;  %v1587_v17 = vor.u32 %v1586_v4, %v1585_v0  ;;  %v1590_v61 = vshll.u32 %v1589_v30, 23  ;;  %v1601_v54 = vsel %vm3750_vm0, 0, %v3761_v42 }
 0x19f   :  { %v1509_v12 = vsel %vm1507_vm4, %v1508_v62, %v2321_v40  ;;  %v1677_v28 = vadd.s32 536870912, %v1676_v55  ;;  %v1730_v59 = vor.u32 8388608, %v1729_v57  ;;  %v1735_v58 = vshrl.u32 %v1734_v13, 5 }
 0x1a0   :  { %v1506_v14 = vsel %vm1504_vm5, %v2319_v19, %v1505_v18  ;;  %v1591_v5 = vor.u32 4788187, %v1590_v61  ;;  %v1594_v1 = vcvt.s32.f32 %v1587_v17  ;;  %v1739_v22 = vshll.u32 %v2410_v31, %v1736_v52 }
 0x1a1   :  { %v1510_v8 = vsel %vm1503_vm15, %v1506_v14, %v1509_v12  ;;  %v3773_v24 = vshrl.u32 %v1677_v28, 30  ;;  %v1740_v41 = vshrl.u32 %v2411_v33, %v1737_v11  ;;  %v1742_v34 = vshll.u32 %v2411_v33, %v1736_v52 }
 0x1a2   :  { %v1511_v45 = vsel %vm1500_vm14, nan, %v1510_v8  ;;  %v1592_v53 = vand.u32 2147483647, %v1591_v5  ;;  %v1743_v2 = vshrl.u32 %v2412_v35, %v1737_v11  ;;  %v1745_v48 = vshll.u32 %v2412_v35, %v1736_v52 }
 0x1a3   :  { %v2001_v38 = vrot.slane %v1511_v45, %v2617_v25  ;;  %v1679_v56 = vshll.u32 %v3773_v24, 30  ;;  %v1746_v51 = vshrl.u32 %v2413_v37, %v1737_v11  ;;  %v1748_v16 = vshll.u32 %v2413_v37, %v1736_v52 }
 0x1a4   :  { %v1595_v3 = vmul.f32 %v1594_v1, %v1592_v53  ;;  %v1749_v6 = vshrl.u32 %v2414_v39, %v1737_v11  ;;  %v1751_v10 = vshll.u32 %v2414_v39, %v1736_v52  ;;  %v1829_v63 = vand.u32 2139095040, %v3777_v43 }
 0x1a5   :  { %2052 = vst [vmem:[#allocation7 + $0x1a0] sm:$0xff] %v2001_v38  ;;  %2053 = vst [vmem:[#allocation7 + $0x1b0] sm:$0xff] %v2001_v38  ;;  %v1680_v46 = vsub.s32 %v1676_v55, %v1679_v56  ;;  %v1738_v44 = vshrl.u32 %v2410_v31, %v1737_v11  ;;  %v1752_v21 = vshrl.u32 %v2415_v47, %v1737_v11  ;;  %v1770_v20 = vshll.u32 %v1730_v59, 8 }
 0x1a6   :  { %v1596_v9 = vxor.u32 2147483648, %v1595_v3  ;;  %v1741_v32 = vor.u32 %v1740_v41, %v1739_v22  ;;  %v1744_v0 = vor.u32 %v1743_v2, %v1742_v34  ;;  %v1750_v23 = vor.u32 %v1749_v6, %v1748_v16 }
 0x1a7   :  { %v1682_v13 = vsub.s32 0, %v1680_v46  ;;  %v1747_v42 = vor.u32 %v1746_v51, %v1745_v48  ;;  %vm1754_vm6 = vcmp.lt.s32.totalorder %v1735_v58, 1  ;;  %vm1755_vm7 = vcmp.lt.s32.totalorder %v1735_v58, 2 }
 0x1a8   :  { %v1597_v57 = vsel %vm1514_vm13, %v1596_v9, %v1595_v3  ;;  %v1753_v52 = vor.u32 %v1752_v21, %v1751_v10  ;;  %vm1756_vm8 = vcmp.lt.s32.totalorder %v1735_v58, 3  ;;  %vm1757_vm9 = vcmp.lt.s32.totalorder %v1735_v58, 4 }
 0x1a9   :  { %v1600_v19 = vsel %vm3750_vm0, %v3557_v60, %v1597_v57  ;;  %v2169_v4 = vmin.u32 %v1682_v13, %v1680_v46  ;;  %v1758_v30 = vsel %vm1754_vm6, %v1738_v44, %v1741_v32  ;;  %v1759_v26 = vsel %vm1757_vm9, %v1747_v42, 2102212464 }
 0x1aa   :  { %2322 = vcosq.f32 %v1600_v19  ;;  %v1760_v40 = vsel %vm1756_vm8, %v1744_v0, %v1759_v26  ;;  %v1762_v62 = vsel %vm1754_vm6, %v1741_v32, %v1744_v0  ;;  %v1763_v55 = vsel %vm1757_vm9, %v1750_v23, 920167782 }
 0x1ab   :  { %2324 = vsinq.f32 %v1600_v19  ;;  %v1684_v11 = vclz %v2169_v4  ;;  %v1766_v18 = vsel %vm1754_vm6, %v1744_v0, %v1747_v42  ;;  %v1605_v17 = vadd.s32 3, %v1601_v54 }
 0x1ac   :  { %v1764_v61 = vsel %vm1756_vm8, %v1747_v42, %v1763_v55  ;;  %v1767_v12 = vsel %vm1757_vm9, %v1753_v52, 1326507024  ;;  %v1761_v28 = vsel %vm1755_vm7, %v1758_v30, %v1760_v40  ;;  %v1830_v8 = vshrl.u32 %v1829_v63, 23 }
 0x1ad   :  { %v2170_v15 = vadd.s32 4294967294, %v1684_v11  ;;  %v1765_v59 = vsel %vm1755_vm7, %v1762_v62, %v1764_v61  ;;  %v1768_v14 = vsel %vm1756_vm8, %v1750_v23, %v1767_v12  ;;  %v1672_v54 = vadd.s32 %v3734_v7, %v3746_v50 }
 0x1ae   :  { %v1769_v5 = vsel %vm1755_vm7, %v1766_v18, %v1768_v14  ;;  %v3806_v1 = vmul.u32.u64.low %v1770_v20, %v1765_v59  ;;  %v3807_v22 = vmul.u32.u64.high %v1770_v20, %v1765_v59, %v3806_v1  ;;  %v2176_v53 = vadd.s32 4294967169, %v1830_v8 }
 0x1af   :  { %vm2171_vm10 = vcmp.lt.s32.totalorder %v2170_v15, 0  ;;  %v3812_v41 = vmul.u32.u64.low %v1770_v20, %v1769_v5  ;;  %v3813_v34 = vmul.u32.u64.high %v1770_v20, %v1769_v5, %v3812_v41  ;;  %v1777_v56 = vmul.u32 %v1770_v20, %v1761_v28 }
 0x1b0   :  { %v1687_v45 = vsel %vm2171_vm10, 0, %v2170_v15  ;;  %v1606_v58 = vand.u32 3, %v1605_v17  ;;  %v1780_v51 = vadd.s32 1, %v3807_v22  ;;  %v1836_v16 = vadd.s32 1, %v2176_v53 }
 0x1b1   :  { %v1688_v2 = vsub.s32 32, %v1687_v45  ;;  %v1689_v48 = vshll.u32 %v1680_v46, %v1687_v45  ;;  %v1692_v38 = vsub.s32 4294967266, %v1687_v45  ;;  %vm1604_vm11 = vweird.f32 %v3557_v60 }
 0x1b2   :  { %vm1779_vm12 = vc.u32 %v3813_v34, %v3806_v1  ;;  %v1702_v7 = vsub.s32 4, %v3773_v24  ;;  %v1826_v10 = vand.u32 2147483647, %v3777_v43  ;;  %vm1837_vm13 = vcmp.gt.s32.totalorder %v1836_v16, 0 }
 0x1b3   :  { %v1690_v3 = vshrl.u32 %v1672_v54, %v1688_v2  ;;  %v1693_v6 = vadd.s32 127, %v1692_v38  ;;  %v1781_v50 = vsel %vm1779_vm12, %v1780_v51, %v3807_v22  ;;  %v1838_v21 = vsel %vm1837_vm13, %v1836_v16, 0 }
 0x1b4   :  { %v1782_v44 = vadd.s32 %v1781_v50, %v1777_v56  ;;  %vm1607_vm14 = vcmp.lt.s32.totalorder %v1606_v58, 2  ;;  %vm3824_vm15 = vcmp.le.f32.partialorder %v1616_v29, 0.7853982  ;;  %vm1618_vm0 = vcmp.lt.s32.totalorder %v3599_v36, 0 }
 0x1b5   :  { %v1691_v63 = vor.u32 %v1690_v3, %v1689_v48  ;;  %v1694_v46 = vshll.u32 %v1693_v6, 23  ;;  %v1840_v9 = vand.u32 31, %v1838_v21  ;;  %vm1611_vm1 = vcmp.eq.s32.totalorder %v1606_v58, 2 }
 0x1b6   :  { %v1783_v13 = vadd.s32 536870912, %v1782_v44  ;;  %vm1608_vm2 = vcmp.eq.s32.totalorder %v1606_v58, 0  ;;  %v1703_v52 = vsel %vm1618_vm0, %v1702_v7, %v3773_v24  ;;  %v1833_v26 = vand.u32 8388607, %v1826_v10 }
 0x1b7   :  { %v2323_v32 = vpop.eup %2322  ;;  %v1695_v0 = vor.u32 4788187, %v1694_v46  ;;  %v1698_v23 = vcvt.s32.f32 %v1691_v63  ;;  %v1841_v19 = vsub.s32 32, %v1840_v9  ;;  %v1843_v62 = vshll.u32 %v2410_v31, %v1840_v9 }
 0x1b8   :  { %v2325_v42 = vpop.eup %2324  ;;  %v1612_v57 = vxor.u32 2147483648, %v2323_v32  ;;  %v3832_v30 = vshrl.u32 %v1783_v13, 30  ;;  %v1846_v11 = vshll.u32 %v2411_v33, %v1840_v9  ;;  %v1705_v15 = vsel %vm3824_vm15, 0, %v1703_v52 }
 0x1b9   :  { %v1609_v29 = vxor.u32 2147483648, %v2325_v42  ;;  %v1696_v4 = vand.u32 2147483647, %v1695_v0  ;;  %v1844_v55 = vshrl.u32 %v2411_v33, %v1841_v19  ;;  %v1847_v24 = vshrl.u32 %v2412_v35, %v1841_v19 }
 0x1ba   :  { %v1613_v40 = vsel %vm1611_vm1, %v1612_v57, %v2325_v42  ;;  %v1785_v61 = vshll.u32 %v3832_v30, 30  ;;  %v1849_v28 = vshll.u32 %v2412_v35, %v1840_v9  ;;  %v1850_v59 = vshrl.u32 %v2413_v37, %v1841_v19 }
 0x1bb   :  { %v1610_v18 = vsel %vm1608_vm2, %v2323_v32, %v1609_v29  ;;  %v1699_v17 = vmul.f32 %v1698_v23, %v1696_v4  ;;  %v1839_v22 = vshrl.u32 %v1838_v21, 5  ;;  %v1834_v54 = vor.u32 8388608, %v1833_v26 }
 0x1bc   :  { %v1614_v12 = vsel %vm1607_vm14, %v1610_v18, %v1613_v40  ;;  %v1786_v33 = vsub.s32 %v1782_v44, %v1785_v61  ;;  %v1845_v41 = vor.u32 %v1844_v55, %v1843_v62  ;;  %v1852_v45 = vshll.u32 %v2413_v37, %v1840_v9 }
 0x1bd   :  { %v1615_v14 = vsel %vm1604_vm11, nan, %v1614_v12  ;;  %v1700_v5 = vxor.u32 2147483648, %v1699_v17  ;;  %v1848_v48 = vor.u32 %v1847_v24, %v1846_v11  ;;  %v1853_v35 = vshrl.u32 %v2414_v39, %v1841_v19 }
 0x1be   :  { %v2005_v8 = vrot.slane %v1615_v14, %v2617_v25  ;;  %v1788_v2 = vsub.s32 0, %v1786_v33  ;;  %v1851_v38 = vor.u32 %v1850_v59, %v1849_v28  ;;  %v1855_v56 = vshll.u32 %v2414_v39, %v1840_v9 }
 0x1bf   :  { %v1701_v53 = vsel %vm1618_vm0, %v1700_v5, %v1699_v17  ;;  %v1856_v58 = vshrl.u32 %v2415_v47, %v1841_v19  ;;  %v1854_v51 = vor.u32 %v1853_v35, %v1852_v45  ;;  %vm1858_vm3 = vcmp.lt.s32.totalorder %v1839_v22, 1 }
 0x1c0   :  { %2054 = vst [vmem:[#allocation7 + $0x1c0] sm:$0xff] %v2005_v8  ;;  %2055 = vst [vmem:[#allocation7 + $0x1d0] sm:$0xff] %v2005_v8  ;;  %v1704_v60 = vsel %vm3824_vm15, %v3599_v36, %v1701_v53  ;;  %v2173_v37 = vmin.u32 %v1788_v2, %v1786_v33  ;;  %v1842_v16 = vshrl.u32 %v2410_v31, %v1841_v19  ;;  %v1709_v6 = vadd.s32 3, %v1705_v15 }
 0x1c1   :  { %2326 = vcosq.f32 %v1704_v60  ;;  %v1857_v3 = vor.u32 %v1856_v58, %v1855_v56  ;;  %vm1860_vm4 = vcmp.lt.s32.totalorder %v1839_v22, 3  ;;  %vm1859_vm5 = vcmp.lt.s32.totalorder %v1839_v22, 2 }
 0x1c2   :  { %2328 = vsinq.f32 %v1704_v60  ;;  %v1790_v7 = vclz %v2173_v37  ;;  %vm1861_vm6 = vcmp.lt.s32.totalorder %v1839_v22, 4  ;;  %v1866_v50 = vsel %vm1858_vm3, %v1845_v41, %v1848_v48 }
 0x1c3   :  { %v1874_v63 = vshll.u32 %v1834_v54, 8  ;;  %v1863_v44 = vsel %vm1861_vm6, %v1851_v38, 2102212464  ;;  %v1867_v39 = vsel %vm1861_vm6, %v1854_v51, 920167782  ;;  %v1870_v21 = vsel %vm1858_vm3, %v1848_v48, %v1851_v38 }
 0x1c4   :  { %v2174_v46 = vadd.s32 4294967294, %v1790_v7  ;;  %v1862_v47 = vsel %vm1858_vm3, %v1842_v16, %v1845_v41  ;;  %v1864_v20 = vsel %vm1860_vm4, %v1848_v48, %v1863_v44  ;;  %v1868_v9 = vsel %vm1860_vm4, %v1851_v38, %v1867_v39 }
 0x1c5   :  { %v1871_v32 = vsel %vm1861_vm6, %v1857_v3, 1326507024  ;;  %v1778_v31 = vadd.s32 %v3806_v1, %v3813_v34  ;;  %v1869_v0 = vsel %vm1859_vm5, %v1866_v50, %v1868_v9  ;;  %v1865_v26 = vsel %vm1859_vm5, %v1862_v47, %v1864_v20 }
 0x1c6   :  { %vm2175_vm7 = vcmp.lt.s32.totalorder %v2174_v46, 0  ;;  %v1872_v23 = vsel %vm1860_vm4, %v1854_v51, %v1871_v32  ;;  %v3866_v57 = vmul.u32.u64.low %v1874_v63, %v1869_v0  ;;  %v3867_v52 = vmul.u32.u64.high %v1874_v63, %v1869_v0, %v3866_v57 }
 0x1c7   :  { %v1793_v13 = vsel %vm2175_vm7, 0, %v2174_v46  ;;  %v1873_v42 = vsel %vm1859_vm5, %v1870_v21, %v1872_v23  ;;  %v1710_v40 = vand.u32 3, %v1709_v6  ;;  %v1881_v11 = vmul.u32 %v1874_v63, %v1865_v26 }
 0x1c8   :  { %v1794_v19 = vsub.s32 32, %v1793_v13  ;;  %v1795_v29 = vshll.u32 %v1786_v33, %v1793_v13  ;;  %v1798_v4 = vsub.s32 4294967266, %v1793_v13  ;;  %v1884_v18 = vadd.s32 1, %v3867_v52 }
 0x1c9   :  { %v3870_v62 = vmul.u32.u64.low %v1874_v63, %v1873_v42  ;;  %v3871_v55 = vmul.u32.u64.high %v1874_v63, %v1873_v42, %v3870_v62  ;;  %vm1712_vm8 = vcmp.eq.s32.totalorder %v1710_v40, 0  ;;  %vm1715_vm9 = vcmp.eq.s32.totalorder %v1710_v40, 2 }
 0x1ca   :  { %v1796_v1 = vshrl.u32 %v1778_v31, %v1794_v19  ;;  %v1799_v34 = vadd.s32 127, %v1798_v4  ;;  %vm1711_vm11 = vcmp.lt.s32.totalorder %v1710_v40, 2  ;;  %vm1708_vm12 = vweird.f32 %v3599_v36 }
 0x1cb   :  { %vm1883_vm10 = vc.u32 %v3871_v55, %v3866_v57  ;;  %vm1724_vm13 = vcmp.lt.s32.totalorder %v3692_v49, 0  ;;  %v1808_v48 = vsub.s32 4, %v3832_v30  ;;  %vm1723_vm14 = vcmp.le.f32.partialorder %v1722_v27, 0.7853982 }
 0x1cc   :  { %v1797_v17 = vor.u32 %v1796_v1, %v1795_v29  ;;  %v1800_v61 = vshll.u32 %v1799_v34, 23  ;;  %v1885_v14 = vsel %vm1883_vm10, %v1884_v18, %v3867_v52  ;;  %v1882_v63 = vadd.s32 %v3866_v57, %v3871_v55 }
 0x1cd   :  { %v1886_v33 = vadd.s32 %v1885_v14, %v1881_v11  ;;  %v1809_v58 = vsel %vm1724_vm13, %v1808_v48, %v3832_v30  ;;  %vm1814_vm3 = vweird.f32 %v3692_v49  ;;  %vm1828_vm4 = vcmp.lt.s32.totalorder %v3777_v43, 0 }
 0x1ce   :  { %v2327_v24 = vpop.eup %2326  ;;  %v1801_v28 = vor.u32 4788187, %v1800_v61  ;;  %v1804_v59 = vcvt.s32.f32 %v1797_v17  ;;  %v1811_v3 = vsel %vm1723_vm14, 0, %v1809_v58  ;;  %vm1827_vm5 = vcmp.le.f32.partialorder %v1826_v10, 0.7853982 }
 0x1cf   :  { %v2329_v12 = vpop.eup %2328  ;;  %v1716_v15 = vxor.u32 2147483648, %v2327_v24  ;;  %v1887_v41 = vadd.s32 536870912, %v1886_v33 }
 0x1d0   :  { %v1713_v5 = vxor.u32 2147483648, %v2329_v12  ;;  %v1802_v8 = vand.u32 2147483647, %v1801_v28 }
 0x1d1   :  { %v1717_v22 = vsel %vm1715_vm9, %v1716_v15, %v2329_v12  ;;  %v3879_v35 = vshrl.u32 %v1887_v41, 30  ;;  %vm1918_vm9 = vweird.f32 %v3777_v43 }
 0x1d2   :  { %v1714_v54 = vsel %vm1712_vm8, %v2327_v24, %v1713_v5  ;;  %v1805_v53 = vmul.f32 %v1804_v59, %v1802_v8 }
 0x1d3   :  { %v1718_v45 = vsel %vm1711_vm11, %v1714_v54, %v1717_v22  ;;  %v1889_v36 = vshll.u32 %v3879_v35, 30  ;;  %v1912_v26 = vsub.s32 4, %v3879_v35 }
 0x1d4   :  { %v1719_v2 = vsel %vm1708_vm12, nan, %v1718_v45  ;;  %v1806_v38 = vxor.u32 2147483648, %v1805_v53 }
 0x1d5   :  { %v2009_v60 = vrot.slane %v1719_v2, %v2617_v25  ;;  %v1890_v51 = vsub.s32 %v1886_v33, %v1889_v36  ;;  %v1815_v25 = vadd.s32 3, %v1811_v3  ;;  %v1913_v55 = vsel %vm1828_vm4, %v1912_v26, %v3879_v35 }
 0x1d6   :  { %v1807_v56 = vsel %vm1724_vm13, %v1806_v38, %v1805_v53  ;;  %v1915_v34 = vsel %vm1827_vm5, 0, %v1913_v55 }
 0x1d7   :  { %2056 = vst [vmem:[#allocation7 + $0x1e0] sm:$0xff] %v2009_v60  ;;  %2057 = vst [vmem:[#allocation7 + $0x1f0] sm:$0xff] %v2009_v60  ;;  %v1810_v37 = vsel %vm1723_vm14, %v3692_v49, %v1807_v56  ;;  %v1892_v16 = vsub.s32 0, %v1890_v51  ;;  %v1816_v27 = vand.u32 3, %v1815_v25  ;;  %v1919_v11 = vadd.s32 3, %v1915_v34 }
 0x1d8   :  { %2330 = vcosq.f32 %v1810_v37 }
 0x1d9   :  { %2332 = vsinq.f32 %v1810_v37  ;;  %v2177_v6 = vmin.u32 %v1892_v16, %v1890_v51  ;;  %vm1821_vm0 = vcmp.eq.s32.totalorder %v1816_v27, 2  ;;  %vm1818_vm1 = vcmp.eq.s32.totalorder %v1816_v27, 0 }
 0x1da   :  { %vm1817_vm2 = vcmp.lt.s32.totalorder %v1816_v27, 2  ;;  %v1920_v18 = vand.u32 3, %v1919_v11 }
 0x1db   :  { %v1894_v7 = vclz %v2177_v6 }
 0x1dc   :  { %vm1925_vm6 = vcmp.eq.s32.totalorder %v1920_v18, 2  ;;  %vm1922_vm7 = vcmp.eq.s32.totalorder %v1920_v18, 0  ;;  %vm1921_vm8 = vcmp.lt.s32.totalorder %v1920_v18, 2 }
 0x1dd   :  { %v2178_v50 = vadd.s32 4294967294, %v1894_v7 }
 0x1df   :  { %vm2179_vm15 = vcmp.lt.s32.totalorder %v2178_v50, 0 }
 0x1e0   :  { %v1897_v46 = vsel %vm2179_vm15, 0, %v2178_v50 }
 0x1e1   :  { %v1898_v44 = vsub.s32 32, %v1897_v46  ;;  %v1899_v39 = vshll.u32 %v1890_v51, %v1897_v46  ;;  %v1902_v21 = vsub.s32 4294967266, %v1897_v46 }
 0x1e3   :  { %v1900_v47 = vshrl.u32 %v1882_v63, %v1898_v44  ;;  %v1903_v20 = vadd.s32 127, %v1902_v21 }
 0x1e5   :  { %v2331_v30 = vpop.eup %2330  ;;  %v1901_v0 = vor.u32 %v1900_v47, %v1899_v39  ;;  %v1904_v23 = vshll.u32 %v1903_v20, 23 }
 0x1e6   :  { %v2333_v9 = vpop.eup %2332  ;;  %v1822_v32 = vxor.u32 2147483648, %v2331_v30 }
 0x1e7   :  { %v1819_v31 = vxor.u32 2147483648, %v2333_v9  ;;  %v1905_v57 = vor.u32 4788187, %v1904_v23  ;;  %v1908_v52 = vcvt.s32.f32 %v1901_v0 }
 0x1e8   :  { %v1823_v13 = vsel %vm1821_vm0, %v1822_v32, %v2333_v9 }
 0x1e9   :  { %v1820_v42 = vsel %vm1818_vm1, %v2331_v30, %v1819_v31  ;;  %v1906_v4 = vand.u32 2147483647, %v1905_v57 }
 0x1ea   :  { %v1824_v19 = vsel %vm1817_vm2, %v1820_v42, %v1823_v13 }
 0x1eb   :  { %v1825_v29 = vsel %vm1814_vm3, nan, %v1824_v19  ;;  %v1909_v49 = vmul.f32 %v1908_v52, %v1906_v4 }
 0x1ec   :  { %2058 = vst [vmem:[#allocation7 + $0x8] sm:$0xff] %v1825_v29  ;;  %2060 = vst [vmem:[#allocation7 + $0x28] sm:$0xff] %v1825_v29 }
 0x1ed   :  { %2062 = vst [vmem:[#allocation7 + $0x48] sm:$0xff] %v1825_v29  ;;  %2064 = vst [vmem:[#allocation7 + $0x68] sm:$0xff] %v1825_v29  ;;  %v1910_v40 = vxor.u32 2147483648, %v1909_v49 }
 0x1ee   :  { %2066 = vst [vmem:[#allocation7 + $0x88] sm:$0xff] %v1825_v29  ;;  %2068 = vst [vmem:[#allocation7 + $0xa8] sm:$0xff] %v1825_v29 }
 0x1ef   :  { %2070 = vst [vmem:[#allocation7 + $0xc8] sm:$0xff] %v1825_v29  ;;  %2072 = vst [vmem:[#allocation7 + $0xe8] sm:$0xff] %v1825_v29  ;;  %v1911_v62 = vsel %vm1828_vm4, %v1910_v40, %v1909_v49 }
 0x1f0   :  { %2074 = vst [vmem:[#allocation7 + $0x108] sm:$0xff] %v1825_v29  ;;  %2076 = vst [vmem:[#allocation7 + $0x128] sm:$0xff] %v1825_v29  ;;  %v1914_v1 = vsel %vm1827_vm5, %v3777_v43, %v1911_v62 }
 0x1f1   :  { %2078 = vst [vmem:[#allocation7 + $0x148] sm:$0xff] %v1825_v29  ;;  %2080 = vst [vmem:[#allocation7 + $0x168] sm:$0xff] %v1825_v29  ;;  %2334 = vcosq.f32 %v1914_v1 }
 0x1f2   :  { %2082 = vst [vmem:[#allocation7 + $0x188] sm:$0xff] %v1825_v29  ;;  %2084 = vst [vmem:[#allocation7 + $0x1a8] sm:$0xff] %v1825_v29  ;;  %2336 = vsinq.f32 %v1914_v1 }
 0x1f3   :  { %2086 = vst [vmem:[#allocation7 + $0x1c8] sm:$0xff] %v1825_v29  ;;  %2088 = vst [vmem:[#allocation7 + $0x1e8] sm:$0xff] %v1825_v29 }
 0x1fe   :  { %v2335_v17 = vpop.eup %2334 }
 0x1ff   :  { %v2337_v61 = vpop.eup %2336  ;;  %v1926_v24 = vxor.u32 2147483648, %v2335_v17 }
 0x200   :  { %v1923_v12 = vxor.u32 2147483648, %v2337_v61 }
 0x201   :  { %v1927_v10 = vsel %vm1925_vm6, %v1926_v24, %v2337_v61 }
 0x202   :  { %v1924_v15 = vsel %vm1922_vm7, %v2335_v17, %v1923_v12 }
 0x203   :  { %v1928_v28 = vsel %vm1921_vm8, %v1924_v15, %v1927_v10 }
 0x204   :  { %v1929_v59 = vsel %vm1918_vm9, nan, %v1928_v28 }
 0x205   :  { %2059 = vst [vmem:[#allocation7 + $0x18] sm:$0xff] %v1929_v59  ;;  %2061 = vst [vmem:[#allocation7 + $0x38] sm:$0xff] %v1929_v59 }
 0x206   :  { %2063 = vst [vmem:[#allocation7 + $0x58] sm:$0xff] %v1929_v59  ;;  %2065 = vst [vmem:[#allocation7 + $0x78] sm:$0xff] %v1929_v59 }
 0x207   :  { %2067 = vst [vmem:[#allocation7 + $0x98] sm:$0xff] %v1929_v59  ;;  %2069 = vst [vmem:[#allocation7 + $0xb8] sm:$0xff] %v1929_v59 }
 0x208   :  { %2071 = vst [vmem:[#allocation7 + $0xd8] sm:$0xff] %v1929_v59  ;;  %2073 = vst [vmem:[#allocation7 + $0xf8] sm:$0xff] %v1929_v59 }
 0x209   :  { %2075 = vst [vmem:[#allocation7 + $0x118] sm:$0xff] %v1929_v59  ;;  %2077 = vst [vmem:[#allocation7 + $0x138] sm:$0xff] %v1929_v59 }
 0x20a   :  { %2079 = vst [vmem:[#allocation7 + $0x158] sm:$0xff] %v1929_v59  ;;  %2081 = vst [vmem:[#allocation7 + $0x178] sm:$0xff] %v1929_v59 }
 0x20b   :  { %2083 = vst [vmem:[#allocation7 + $0x198] sm:$0xff] %v1929_v59  ;;  %2085 = vst [vmem:[#allocation7 + $0x1b8] sm:$0xff] %v1929_v59 }
 0x20c   :  { %2087 = vst [vmem:[#allocation7 + $0x1d8] sm:$0xff] %v1929_v59  ;;  %2089 = vst [vmem:[#allocation7 + $0x1f8] sm:$0xff] %v1929_v59 }
 0x20d   :  { %2389 = shalt.err (!%p2386_p0)
}
 0x20e   :  { %s2417_s24 = smov 256  }
 0x20f   :  { %2101 = dma.vmem_to_hbm [thread:$0]  %s3896_s1, 8192, %s3909_s2, [#allocation4], %s2417_s24, %s2417_s24, %s2405_s12  }
 0x210   :  { %2402 = dma.done.wait [#allocation4], 8192  }
 0x211   :  { %2403 = vsyncadd [#allocation4], 4294959104 }
 0x212   :  { %2105 = vsyncpa [#allocation3], 1 }
 0x213   :  { %2106 = vsyncpa [#allocation6], 1 }
 0x214   :  { %2107 = vsyncpa [#allocation4], 1 }

</bundles_post_ra>
